<compile_context>
chip_gen: v6e
topology: v6e:2x2x1
jax: 0.10.0
libtpu: 0.0.40
codegen_flags: <defaults>
</compile_context>

<pallas_src>
import numpy as np
import jax
import jax.numpy as jnp
from jax.experimental import pallas as pl
from jax.experimental.pallas import tpu as pltpu


# ---------------------------------------------------------------------------
# In-kernel helpers
# ---------------------------------------------------------------------------

def _bn_relu_per_view(u, g, beta, rows_per_view, eps=1e-5):
    """Training-mode BatchNorm1d (biased one-pass stats) + ReLU, f32.

    `u` holds both views stacked along rows ([2B, N]).  The PyTorch forward
    runs the MLP once per view, so BN statistics are computed per view over
    each half (rows_per_view == B is a static, sublane-tile-aligned split).
    """
    def bn(uv):
        inv_b = 1.0 / uv.shape[0]
        mu = jnp.sum(uv, axis=0, keepdims=True) * inv_b
        ex2 = jnp.sum(uv * uv, axis=0, keepdims=True) * inv_b
        var = ex2 - mu * mu
        return (uv - mu) * jax.lax.rsqrt(var + eps)

    y = jnp.concatenate([bn(u[:rows_per_view]), bn(u[rows_per_view:])], axis=0)
    return jnp.maximum(y * g + beta, 0.0)


def _mlp(h, w1, b1, g, bt, w2, b2, rows_per_view):
    """Canonical BYOL MLP head: Linear -> BN -> ReLU -> Linear (per-view BN)."""
    u = jnp.dot(h.astype(jnp.bfloat16), w1,
                preferred_element_type=jnp.float32) + b1
    a = _bn_relu_per_view(u, g, bt, rows_per_view)
    return jnp.dot(a.astype(jnp.bfloat16), w2,
                   preferred_element_type=jnp.float32) + b2


def _cos_loss(p, z):
    """2 - 2 * cosine_similarity(p, z), per sample, keepdims."""
    pn = p * jax.lax.rsqrt(
        jnp.maximum(jnp.sum(p * p, axis=-1, keepdims=True), 1e-12))
    zn = z * jax.lax.rsqrt(
        jnp.maximum(jnp.sum(z * z, axis=-1, keepdims=True), 1e-12))
    return 2.0 - 2.0 * jnp.sum(pn * zn, axis=-1, keepdims=True)


# ---------------------------------------------------------------------------
# Fused kernel: encoder (K-tiled) + projection + prediction + symmetric loss
#   grid = (k_tile,), dimension_semantics = ("arbitrary",)
# ---------------------------------------------------------------------------

def make_byol_kernel(rows_per_view):
    def byol_kernel(x_ref, we_ref, be_ref,
                    w1_ref, b1_ref, g1_ref, bt1_ref, w2_ref, b2_ref,
                    w3_ref, b3_ref, g3_ref, bt3_ref, w4_ref, b4_ref,
                    loss_ref, acc_ref):
        k = pl.program_id(0)

        @pl.when(k == 0)
        def _():
            acc_ref[...] = jnp.zeros_like(acc_ref)

        # Encoder matmul for both views at once ([2B, block_k] @ [block_k, E]),
        # bf16 operands, f32 accumulation.
        acc_ref[...] += jnp.dot(x_ref[...], we_ref[...],
                                preferred_element_type=jnp.float32)

        @pl.when(k == pl.num_programs(0) - 1)
        def _():
            # Hoist all bias/gamma/beta/weight loads once per epilogue.
            be = be_ref[...]
            w1 = w1_ref[...]; b1 = b1_ref[...]; g1 = g1_ref[...]; bt1 = bt1_ref[...]
            w2 = w2_ref[...]; b2 = b2_ref[...]
            w3 = w3_ref[...]; b3 = b3_ref[...]; g3 = g3_ref[...]; bt3 = bt3_ref[...]
            w4 = w4_ref[...]; b4 = b4_ref[...]

            h = acc_ref[...] + be                                   # [2B, E]
            # Teacher = deepcopy of the online encoder + projection head at
            # init (identical weights), so z doubles as the per-view teacher
            # prediction; p is the online prediction.  No separate teacher
            # branch is computed.  (Forward only; no stop_gradient semantics.)
            z = _mlp(h, w1, b1, g1, bt1, w2, b2, rows_per_view)     # [2B, P]
            p = _mlp(z, w3, b3, g3, bt3, w4, b4, rows_per_view)     # [2B, P]

            B = rows_per_view
            # loss(online_pred1, teacher_pred2) + loss(online_pred2, teacher_pred1)
            loss = _cos_loss(p[:B], z[B:]) + _cos_loss(p[B:], z[:B])   # [B, 1]
            loss_ref[...] = jnp.mean(loss).reshape(1, 1)

    return byol_kernel


# ---------------------------------------------------------------------------
# Host-side wrapper
# ---------------------------------------------------------------------------

def init_params(key, d_in, enc_out, hidden, proj_dim):
    """PyTorch-style uniform(+-1/sqrt(fan_in)) init.  Weights stored [in, out]."""
    def linear(k, fan_in, fan_out):
        kw, kb = jax.random.split(k)
        bound = 1.0 / np.sqrt(fan_in)
        w = jax.random.uniform(kw, (fan_in, fan_out), jnp.float32, -bound, bound)
        b = jax.random.uniform(kb, (1, fan_out), jnp.float32, -bound, bound)
        return w, b

    ks = jax.random.split(key, 5)
    we, be = linear(ks[0], d_in, enc_out)          # synthetic encoder (Flatten+Linear)
    w1, b1 = linear(ks[1], enc_out, hidden)        # projection head layer 1
    g1 = jnp.ones((1, hidden), jnp.float32)
    bt1 = jnp.zeros((1, hidden), jnp.float32)
    w2, b2 = linear(ks[2], hidden, proj_dim)       # projection head layer 2
    w3, b3 = linear(ks[3], proj_dim, hidden)       # prediction head layer 1
    g3 = jnp.ones((1, hidden), jnp.float32)
    bt3 = jnp.zeros((1, hidden), jnp.float32)
    w4, b4 = linear(ks[4], hidden, proj_dim)       # prediction head layer 2
    return (we, be, w1, b1, g1, bt1, w2, b2, w3, b3, g3, bt3, w4, b4)


def byol_forward(x, params, *, block_k=None):
    """BYOLNetwork.forward(x) -> scalar loss, as one fused pallas_call."""
    B, C, H, W = x.shape
    D = C * H * W
    (we, be, w1, b1, g1, bt1, w2, b2, w3, b3, g3, bt3, w4, b4) = params
    E = we.shape[1]
    Hd = w1.shape[1]
    P = w2.shape[1]

    if block_k is None:
        block_k = D                       # collapse the K axis at small D (1 grid step)
    assert D % block_k == 0
    n_k = D // block_k

    # TODO(synk): the stochastic SimCLR augmentation pipelines (random resized
    # crop / color jitter / blur) have no clean deterministic Pallas
    # equivalent; deterministic horizontal / vertical flips stand in for
    # augs1 / augs2.  Flips are applied to x here (tiny B x D activations) so
    # the (D, E) encoder weight is streamed from HBM exactly once.
    x1 = jnp.flip(x, axis=3).reshape(B, D)      # "augs1": flip W
    x2 = jnp.flip(x, axis=2).reshape(B, D)      # "augs2": flip H
    xv = jnp.concatenate([x1, x2], axis=0).astype(jnp.bfloat16)     # [2B, D]
    we_bf = we.astype(jnp.bfloat16)

    bf = lambda a: a.astype(jnp.bfloat16)
    f32 = lambda a: a.astype(jnp.float32)
    const = lambda k: (0, 0)                   # constant-index weight/bias blocks

    # Advisory cost estimate (encoder + two MLP heads on 2B rows).
    flops = 2 * (2 * B) * (D * E + E * Hd + Hd * P + P * Hd + Hd * P)
    transcendentals = 4 * Hd + 4 * B                 # BN rsqrt + loss rsqrt
    bytes_accessed = (2 * B * D + D * E + E * Hd + 3 * Hd * P) * 2 \
                     + (E + 6 * Hd + 2 * P) * 4 + 4

    # VMEM budget derived from the chosen block_k (double-buffered tiles).
    vmem_est = (2 * (2 * B * block_k + block_k * E) * 2        # x / we tiles, bf16
                + (E * Hd + 3 * Hd * P) * 2 * 2                # head weights, bf16
                + (E + 6 * Hd + 2 * P) * 4 * 2                 # bias/gamma/beta, f32
                + (2 * B) * E * 4                              # accumulator scratch
                + (1 << 20))                                   # epilogue headroom
    vmem_limit = int(max(2 * vmem_est, 16 * 1024 * 1024))

    grid_spec = pltpu.PrefetchScalarGridSpec(
        num_scalar_prefetch=0,
        grid=(n_k,),
        in_specs=[
            pl.BlockSpec((2 * B, block_k), lambda k: (0, k)),   # stacked views
            pl.BlockSpec((block_k, E), lambda k: (k, 0)),       # encoder weight
            pl.BlockSpec((1, E), const),                        # be
            pl.BlockSpec((E, Hd), const),                       # w1
            pl.BlockSpec((1, Hd), const),                       # b1
            pl.BlockSpec((1, Hd), const),                       # g1
            pl.BlockSpec((1, Hd), const),                       # bt1
            pl.BlockSpec((Hd, P), const),                       # w2
            pl.BlockSpec((1, P), const),                        # b2
            pl.BlockSpec((P, Hd), const),                       # w3
            pl.BlockSpec((1, Hd), const),                       # b3
            pl.BlockSpec((1, Hd), const),                       # g3
            pl.BlockSpec((1, Hd), const),                       # bt3
            pl.BlockSpec((Hd, P), const),                       # w4
            pl.BlockSpec((1, P), const),                        # b4
        ],
        out_specs=pl.BlockSpec((1, 1), const),                  # scalar loss
        scratch_shapes=[pltpu.VMEM((2 * B, E), jnp.float32)],   # encoder accumulator
    )

    out = pl.pallas_call(
        make_byol_kernel(B),
        grid_spec=grid_spec,
        out_shape=jax.ShapeDtypeStruct((1, 1), jnp.float32),
        compiler_params=pltpu.CompilerParams(
            dimension_semantics=("arbitrary",),
            vmem_limit_bytes=vmem_limit),
        cost_estimate=pl.CostEstimate(
            flops=int(flops),
            transcendentals=int(transcendentals),
            bytes_accessed=int(bytes_accessed)),
    )(xv, we_bf, f32(be),
      bf(w1), f32(b1), f32(g1), f32(bt1), bf(w2), f32(b2),
      bf(w3), f32(b3), f32(g3), f32(bt3), bf(w4), f32(b4))
    return out[0, 0]


# ---------------------------------------------------------------------------
# Pure-jnp reference (mirrors the kernel's bf16-operand / f32-accumulate
# matmul policy so the comparison isolates the Pallas implementation).
# ---------------------------------------------------------------------------

def reference(x, params):
    (we, be, w1, b1, g1, bt1, w2, b2, w3, b3, g3, bt3, w4, b4) = params

    def lin(h, w, b):
        return jnp.dot(h.astype(jnp.bfloat16), w.astype(jnp.bfloat16),
                       preferred_element_type=jnp.float32) + b

    def bnrelu(u, g, bt, eps=1e-5):
        mu = u.mean(0, keepdims=True)
        var = ((u - mu) ** 2).mean(0, keepdims=True)
        return jnp.maximum((u - mu) / jnp.sqrt(var + eps) * g + bt, 0.0)

    def proj(h):
        return lin(bnrelu(lin(h, w1, b1), g1, bt1), w2, b2)

    def pred(z):
        return lin(bnrelu(lin(z, w3, b3), g3, bt3), w4, b4)

    def online(xf):
        return pred(proj(lin(xf, we, be)))

    def teacher(xf):
        return proj(lin(xf, we, be))

    def loss(p, z):
        pn = p / jnp.maximum(jnp.linalg.norm(p, axis=-1, keepdims=True), 1e-6)
        zn = z / jnp.maximum(jnp.linalg.norm(z, axis=-1, keepdims=True), 1e-6)
        return 2.0 - 2.0 * jnp.sum(pn * zn, axis=-1, keepdims=True)

    B = x.shape[0]
    x1 = jnp.flip(x, 3).reshape(B, -1)
    x2 = jnp.flip(x, 2).reshape(B, -1)
    return jnp.mean(loss(online(x1), teacher(x2)) + loss(online(x2), teacher(x1)))


if __name__ == "__main__":
    key = jax.random.PRNGKey(0)
    kx, kp = jax.random.split(key)

    # Small shapes, all feature dims 128-lane aligned (scaled-down versions of
    # BYOLNetwork's encoder_out=1000 / projection_dim=256 / MLP hidden).
    B, C, H, W = 8, 4, 16, 16                      # D = C*H*W = 1024
    enc_out, hidden, proj_dim = 128, 256, 128

    x = jax.random.normal(kx, (B, C, H, W), jnp.float32)
    params = init_params(kp, C * H * W, enc_out, hidden, proj_dim)

    loss = jax.block_until_ready(byol_forward(x, params))
    ref = jax.block_until_ready(reference(x, params))
    np.testing.assert_allclose(np.asarray(loss), np.asarray(ref),
                               rtol=1e-2, atol=1e-2)
    print("KERNEL_OK")
</pallas_src>

<mosaic_0001>
module attributes {stable_mosaic.version = 11 : i64} {
  func.func @byol_kernel(%arg0: i32, %arg1: memref<16x1024xbf16, #tpu.memory_space<vmem>>, %arg2: memref<1024x128xbf16, #tpu.memory_space<vmem>>, %arg3: memref<1x128xf32, #tpu.memory_space<vmem>>, %arg4: memref<128x256xbf16, #tpu.memory_space<vmem>>, %arg5: memref<1x256xf32, #tpu.memory_space<vmem>>, %arg6: memref<1x256xf32, #tpu.memory_space<vmem>>, %arg7: memref<1x256xf32, #tpu.memory_space<vmem>>, %arg8: memref<256x128xbf16, #tpu.memory_space<vmem>>, %arg9: memref<1x128xf32, #tpu.memory_space<vmem>>, %arg10: memref<128x256xbf16, #tpu.memory_space<vmem>>, %arg11: memref<1x256xf32, #tpu.memory_space<vmem>>, %arg12: memref<1x256xf32, #tpu.memory_space<vmem>>, %arg13: memref<1x256xf32, #tpu.memory_space<vmem>>, %arg14: memref<256x128xbf16, #tpu.memory_space<vmem>>, %arg15: memref<1x128xf32, #tpu.memory_space<vmem>>, %arg16: memref<1x1xf32, #tpu.memory_space<vmem>>, %arg17: memref<16x128xf32, #tpu.memory_space<vmem>>) attributes {dimension_semantics = [#tpu.dimension_semantics<arbitrary>], iteration_bounds = array<i64: 1>, scalar_prefetch = 0 : i64, scratch_operands = 1 : i64, tpu.core_type = #tpu.core_type<tc>, window_params = [{transform_indices = @transform_0, window_bounds = array<i64: 16, 1024>}, {transform_indices = @transform_1, window_bounds = array<i64: 1024, 128>}, {pipeline_mode = #tpu.pipeline_mode<synchronous>, transform_indices = @transform_2, window_bounds = array<i64: 1, 128>}, {pipeline_mode = #tpu.pipeline_mode<synchronous>, transform_indices = @transform_3, window_bounds = array<i64: 128, 256>}, {pipeline_mode = #tpu.pipeline_mode<synchronous>, transform_indices = @transform_4, window_bounds = array<i64: 1, 256>}, {pipeline_mode = #tpu.pipeline_mode<synchronous>, transform_indices = @transform_5, window_bounds = array<i64: 1, 256>}, {pipeline_mode = #tpu.pipeline_mode<synchronous>, transform_indices = @transform_6, window_bounds = array<i64: 1, 256>}, {pipeline_mode = #tpu.pipeline_mode<synchronous>, transform_indices = @transform_7, window_bounds = array<i64: 256, 128>}, {pipeline_mode = #tpu.pipeline_mode<synchronous>, transform_indices = @transform_8, window_bounds = array<i64: 1, 128>}, {pipeline_mode = #tpu.pipeline_mode<synchronous>, transform_indices = @transform_9, window_bounds = array<i64: 128, 256>}, {pipeline_mode = #tpu.pipeline_mode<synchronous>, transform_indices = @transform_10, window_bounds = array<i64: 1, 256>}, {pipeline_mode = #tpu.pipeline_mode<synchronous>, transform_indices = @transform_11, window_bounds = array<i64: 1, 256>}, {pipeline_mode = #tpu.pipeline_mode<synchronous>, transform_indices = @transform_12, window_bounds = array<i64: 1, 256>}, {pipeline_mode = #tpu.pipeline_mode<synchronous>, transform_indices = @transform_13, window_bounds = array<i64: 256, 128>}, {pipeline_mode = #tpu.pipeline_mode<synchronous>, transform_indices = @transform_14, window_bounds = array<i64: 1, 128>}, {pipeline_mode = #tpu.pipeline_mode<synchronous>, transform_indices = @transform_15, window_bounds = array<i64: 1, 1>}]} {
    %c0_i32 = arith.constant 0 : i32
    %0 = arith.cmpi eq, %arg0, %c0_i32 : i32
    %1 = arith.extui %0 : i1 to i32
    %c0_i32_0 = arith.constant 0 : i32
    %2 = arith.cmpi ne, %1, %c0_i32_0 : i32
    scf.if %2 {
      %cst_10 = arith.constant 0.000000e+00 : f32
      %12 = vector.broadcast %cst_10 : f32 to vector<16x128xf32>
      %c0_11 = arith.constant 0 : index
      %c0_12 = arith.constant 0 : index
      %13 = vector.load %arg17[%c0_11, %c0_12] : memref<16x128xf32, #tpu.memory_space<vmem>>, vector<16x128xf32>
      tpu.vector_store %arg17[%c0_11, %c0_12], %12 {strides = array<i32>} : memref<16x128xf32, #tpu.memory_space<vmem>>, vector<16x128xf32>,
    } else {
    }
    %c0 = arith.constant 0 : index
    %c0_1 = arith.constant 0 : index
    %3 = vector.load %arg17[%c0, %c0_1] : memref<16x128xf32, #tpu.memory_space<vmem>>, vector<16x128xf32>
    %c0_2 = arith.constant 0 : index
    %c0_3 = arith.constant 0 : index
    %4 = vector.load %arg1[%c0_2, %c0_3] : memref<16x1024xbf16, #tpu.memory_space<vmem>>, vector<16x1024xbf16>
    %c0_4 = arith.constant 0 : index
    %c0_5 = arith.constant 0 : index
    %5 = vector.load %arg2[%c0_4, %c0_5] : memref<1024x128xbf16, #tpu.memory_space<vmem>>, vector<1024x128xbf16>
    %cst = arith.constant dense<0.000000e+00> : vector<16x128xf32>
    %6 = tpu.matmul %4, %5, %cst {dimension_numbers = #tpu.dot_dimension_numbers<[1], [0], [0], [1], [0, 0, 1, 1], [], []>} : vector<16x1024xbf16>, vector<1024x128xbf16>, vector<16x128xf32> -> vector<16x128xf32>
    %7 = arith.addf %3, %6 : vector<16x128xf32>
    %c0_6 = arith.constant 0 : index
    %c0_7 = arith.constant 0 : index
    %8 = vector.load %arg17[%c0_6, %c0_7] : memref<16x128xf32, #tpu.memory_space<vmem>>, vector<16x128xf32>
    tpu.vector_store %arg17[%c0_6, %c0_7], %7 {strides = array<i32>} : memref<16x128xf32, #tpu.memory_space<vmem>>, vector<16x128xf32>,
    %c0_i32_8 = arith.constant 0 : i32
    %9 = arith.cmpi eq, %arg0, %c0_i32_8 : i32
    %10 = arith.extui %9 : i1 to i32
    %c0_i32_9 = arith.constant 0 : i32
    %11 = arith.cmpi ne, %10, %c0_i32_9 : i32
    scf.if %11 {
      %c0_10 = arith.constant 0 : index
      %c0_11 = arith.constant 0 : index
      %12 = vector.load %arg3[%c0_10, %c0_11] : memref<1x128xf32, #tpu.memory_space<vmem>>, vector<1x128xf32>
      %c0_12 = arith.constant 0 : index
      %c0_13 = arith.constant 0 : index
      %13 = vector.load %arg4[%c0_12, %c0_13] : memref<128x256xbf16, #tpu.memory_space<vmem>>, vector<128x256xbf16>
      %c0_14 = arith.constant 0 : index
      %c0_15 = arith.constant 0 : index
      %14 = vector.load %arg5[%c0_14, %c0_15] : memref<1x256xf32, #tpu.memory_space<vmem>>, vector<1x256xf32>
      %c0_16 = arith.constant 0 : index
      %c0_17 = arith.constant 0 : index
      %15 = vector.load %arg6[%c0_16, %c0_17] : memref<1x256xf32, #tpu.memory_space<vmem>>, vector<1x256xf32>
      %c0_18 = arith.constant 0 : index
      %c0_19 = arith.constant 0 : index
      %16 = vector.load %arg7[%c0_18, %c0_19] : memref<1x256xf32, #tpu.memory_space<vmem>>, vector<1x256xf32>
      %c0_20 = arith.constant 0 : index
      %c0_21 = arith.constant 0 : index
      %17 = vector.load %arg8[%c0_20, %c0_21] : memref<256x128xbf16, #tpu.memory_space<vmem>>, vector<256x128xbf16>
      %c0_22 = arith.constant 0 : index
      %c0_23 = arith.constant 0 : index
      %18 = vector.load %arg9[%c0_22, %c0_23] : memref<1x128xf32, #tpu.memory_space<vmem>>, vector<1x128xf32>
      %c0_24 = arith.constant 0 : index
      %c0_25 = arith.constant 0 : index
      %19 = vector.load %arg10[%c0_24, %c0_25] : memref<128x256xbf16, #tpu.memory_space<vmem>>, vector<128x256xbf16>
      %c0_26 = arith.constant 0 : index
      %c0_27 = arith.constant 0 : index
      %20 = vector.load %arg11[%c0_26, %c0_27] : memref<1x256xf32, #tpu.memory_space<vmem>>, vector<1x256xf32>
      %c0_28 = arith.constant 0 : index
      %c0_29 = arith.constant 0 : index
      %21 = vector.load %arg12[%c0_28, %c0_29] : memref<1x256xf32, #tpu.memory_space<vmem>>, vector<1x256xf32>
      %c0_30 = arith.constant 0 : index
      %c0_31 = arith.constant 0 : index
      %22 = vector.load %arg13[%c0_30, %c0_31] : memref<1x256xf32, #tpu.memory_space<vmem>>, vector<1x256xf32>
      %c0_32 = arith.constant 0 : index
      %c0_33 = arith.constant 0 : index
      %23 = vector.load %arg14[%c0_32, %c0_33] : memref<256x128xbf16, #tpu.memory_space<vmem>>, vector<256x128xbf16>
      %c0_34 = arith.constant 0 : index
      %c0_35 = arith.constant 0 : index
      %24 = vector.load %arg15[%c0_34, %c0_35] : memref<1x128xf32, #tpu.memory_space<vmem>>, vector<1x128xf32>
      %c0_36 = arith.constant 0 : index
      %c0_37 = arith.constant 0 : index
      %25 = vector.load %arg17[%c0_36, %c0_37] : memref<16x128xf32, #tpu.memory_space<vmem>>, vector<16x128xf32>
      %26 = vector.broadcast %12 : vector<1x128xf32> to vector<16x128xf32>
      %27 = arith.addf %25, %26 : vector<16x128xf32>
      %28 = arith.truncf %27 : vector<16x128xf32> to vector<16x128xbf16>
      %cst_38 = arith.constant dense<0.000000e+00> : vector<16x256xf32>
      %29 = tpu.matmul %28, %13, %cst_38 {dimension_numbers = #tpu.dot_dimension_numbers<[1], [0], [0], [1], [0, 0, 1, 1], [], []>} : vector<16x128xbf16>, vector<128x256xbf16>, vector<16x256xf32> -> vector<16x256xf32>
      %30 = vector.broadcast %14 : vector<1x256xf32> to vector<16x256xf32>
      %31 = arith.addf %29, %30 : vector<16x256xf32>
      %32 = vector.extract_strided_slice %31 {offsets = [0, 0], sizes = [8, 256], strides = [1, 1]} : vector<16x256xf32> to vector<8x256xf32>
      %cst_39 = arith.constant dense<0.000000e+00> : vector<256xf32>
      %33 = vector.multi_reduction <add>, %32, %cst_39 [0] : vector<8x256xf32> to vector<256xf32>
      %34 = vector.shape_cast %33 : vector<256xf32> to vector<1x256xf32>
      %cst_40 = arith.constant 1.250000e-01 : f32
      %35 = vector.broadcast %cst_40 : f32 to vector<1x256xf32>
      %36 = arith.mulf %34, %35 : vector<1x256xf32>
      %37 = arith.mulf %32, %32 : vector<8x256xf32>
      %cst_41 = arith.constant dense<0.000000e+00> : vector<256xf32>
      %38 = vector.multi_reduction <add>, %37, %cst_41 [0] : vector<8x256xf32> to vector<256xf32>
      %39 = vector.shape_cast %38 : vector<256xf32> to vector<1x256xf32>
      %cst_42 = arith.constant 1.250000e-01 : f32
      %40 = vector.broadcast %cst_42 : f32 to vector<1x256xf32>
      %41 = arith.mulf %39, %40 : vector<1x256xf32>
      %42 = arith.mulf %36, %36 : vector<1x256xf32>
      %43 = arith.subf %41, %42 : vector<1x256xf32>
      %44 = vector.broadcast %36 : vector<1x256xf32> to vector<8x256xf32>
      %45 = arith.subf %32, %44 : vector<8x256xf32>
      %cst_43 = arith.constant 9.99999974E-6 : f32
      %46 = vector.broadcast %cst_43 : f32 to vector<1x256xf32>
      %47 = arith.addf %43, %46 : vector<1x256xf32>
      %48 = math.rsqrt %47 : vector<1x256xf32>
      %49 = vector.broadcast %48 : vector<1x256xf32> to vector<8x256xf32>
      %50 = arith.mulf %45, %49 : vector<8x256xf32>
      %51 = vector.extract_strided_slice %31 {offsets = [8, 0], sizes = [8, 256], strides = [1, 1]} : vector<16x256xf32> to vector<8x256xf32>
      %cst_44 = arith.constant dense<0.000000e+00> : vector<256xf32>
      %52 = vector.multi_reduction <add>, %51, %cst_44 [0] : vector<8x256xf32> to vector<256xf32>
      %53 = vector.shape_cast %52 : vector<256xf32> to vector<1x256xf32>
      %cst_45 = arith.constant 1.250000e-01 : f32
      %54 = vector.broadcast %cst_45 : f32 to vector<1x256xf32>
      %55 = arith.mulf %53, %54 : vector<1x256xf32>
      %56 = arith.mulf %51, %51 : vector<8x256xf32>
      %cst_46 = arith.constant dense<0.000000e+00> : vector<256xf32>
      %57 = vector.multi_reduction <add>, %56, %cst_46 [0] : vector<8x256xf32> to vector<256xf32>
      %58 = vector.shape_cast %57 : vector<256xf32> to vector<1x256xf32>
      %cst_47 = arith.constant 1.250000e-01 : f32
      %59 = vector.broadcast %cst_47 : f32 to vector<1x256xf32>
      %60 = arith.mulf %58, %59 : vector<1x256xf32>
      %61 = arith.mulf %55, %55 : vector<1x256xf32>
      %62 = arith.subf %60, %61 : vector<1x256xf32>
      %63 = vector.broadcast %55 : vector<1x256xf32> to vector<8x256xf32>
      %64 = arith.subf %51, %63 : vector<8x256xf32>
      %cst_48 = arith.constant 9.99999974E-6 : f32
      %65 = vector.broadcast %cst_48 : f32 to vector<1x256xf32>
      %66 = arith.addf %62, %65 : vector<1x256xf32>
      %67 = math.rsqrt %66 : vector<1x256xf32>
      %68 = vector.broadcast %67 : vector<1x256xf32> to vector<8x256xf32>
      %69 = arith.mulf %64, %68 : vector<8x256xf32>
      %70 = tpu.concatenate %50, %69 in 0 : vector<8x256xf32>, vector<8x256xf32> -> vector<16x256xf32>
      %71 = vector.broadcast %15 : vector<1x256xf32> to vector<16x256xf32>
      %72 = arith.mulf %70, %71 : vector<16x256xf32>
      %73 = vector.broadcast %16 : vector<1x256xf32> to vector<16x256xf32>
      %74 = arith.addf %72, %73 : vector<16x256xf32>
      %cst_49 = arith.constant 0.000000e+00 : f32
      %75 = vector.broadcast %cst_49 : f32 to vector<16x256xf32>
      %76 = arith.maximumf %74, %75 : vector<16x256xf32>
      %77 = arith.truncf %76 : vector<16x256xf32> to vector<16x256xbf16>
      %cst_50 = arith.constant dense<0.000000e+00> : vector<16x128xf32>
      %78 = tpu.matmul %77, %17, %cst_50 {dimension_numbers = #tpu.dot_dimension_numbers<[1], [0], [0], [1], [0, 0, 1, 1], [], []>} : vector<16x256xbf16>, vector<256x128xbf16>, vector<16x128xf32> -> vector<16x128xf32>
      %79 = vector.broadcast %18 : vector<1x128xf32> to vector<16x128xf32>
      %80 = arith.addf %78, %79 : vector<16x128xf32>
      %81 = arith.truncf %80 : vector<16x128xf32> to vector<16x128xbf16>
      %cst_51 = arith.constant dense<0.000000e+00> : vector<16x256xf32>
      %82 = tpu.matmul %81, %19, %cst_51 {dimension_numbers = #tpu.dot_dimension_numbers<[1], [0], [0], [1], [0, 0, 1, 1], [], []>} : vector<16x128xbf16>, vector<128x256xbf16>, vector<16x256xf32> -> vector<16x256xf32>
      %83 = vector.broadcast %20 : vector<1x256xf32> to vector<16x256xf32>
      %84 = arith.addf %82, %83 : vector<16x256xf32>
      %85 = vector.extract_strided_slice %84 {offsets = [0, 0], sizes = [8, 256], strides = [1, 1]} : vector<16x256xf32> to vector<8x256xf32>
      %cst_52 = arith.constant dense<0.000000e+00> : vector<256xf32>
      %86 = vector.multi_reduction <add>, %85, %cst_52 [0] : vector<8x256xf32> to vector<256xf32>
      %87 = vector.shape_cast %86 : vector<256xf32> to vector<1x256xf32>
      %cst_53 = arith.constant 1.250000e-01 : f32
      %88 = vector.broadcast %cst_53 : f32 to vector<1x256xf32>
      %89 = arith.mulf %87, %88 : vector<1x256xf32>
      %90 = arith.mulf %85, %85 : vector<8x256xf32>
      %cst_54 = arith.constant dense<0.000000e+00> : vector<256xf32>
      %91 = vector.multi_reduction <add>, %90, %cst_54 [0] : vector<8x256xf32> to vector<256xf32>
      %92 = vector.shape_cast %91 : vector<256xf32> to vector<1x256xf32>
      %cst_55 = arith.constant 1.250000e-01 : f32
      %93 = vector.broadcast %cst_55 : f32 to vector<1x256xf32>
      %94 = arith.mulf %92, %93 : vector<1x256xf32>
      %95 = arith.mulf %89, %89 : vector<1x256xf32>
      %96 = arith.subf %94, %95 : vector<1x256xf32>
      %97 = vector.broadcast %89 : vector<1x256xf32> to vector<8x256xf32>
      %98 = arith.subf %85, %97 : vector<8x256xf32>
      %cst_56 = arith.constant 9.99999974E-6 : f32
      %99 = vector.broadcast %cst_56 : f32 to vector<1x256xf32>
      %100 = arith.addf %96, %99 : vector<1x256xf32>
      %101 = math.rsqrt %100 : vector<1x256xf32>
      %102 = vector.broadcast %101 : vector<1x256xf32> to vector<8x256xf32>
      %103 = arith.mulf %98, %102 : vector<8x256xf32>
      %104 = vector.extract_strided_slice %84 {offsets = [8, 0], sizes = [8, 256], strides = [1, 1]} : vector<16x256xf32> to vector<8x256xf32>
      %cst_57 = arith.constant dense<0.000000e+00> : vector<256xf32>
      %105 = vector.multi_reduction <add>, %104, %cst_57 [0] : vector<8x256xf32> to vector<256xf32>
      %106 = vector.shape_cast %105 : vector<256xf32> to vector<1x256xf32>
      %cst_58 = arith.constant 1.250000e-01 : f32
      %107 = vector.broadcast %cst_58 : f32 to vector<1x256xf32>
      %108 = arith.mulf %106, %107 : vector<1x256xf32>
      %109 = arith.mulf %104, %104 : vector<8x256xf32>
      %cst_59 = arith.constant dense<0.000000e+00> : vector<256xf32>
      %110 = vector.multi_reduction <add>, %109, %cst_59 [0] : vector<8x256xf32> to vector<256xf32>
      %111 = vector.shape_cast %110 : vector<256xf32> to vector<1x256xf32>
      %cst_60 = arith.constant 1.250000e-01 : f32
      %112 = vector.broadcast %cst_60 : f32 to vector<1x256xf32>
      %113 = arith.mulf %111, %112 : vector<1x256xf32>
      %114 = arith.mulf %108, %108 : vector<1x256xf32>
      %115 = arith.subf %113, %114 : vector<1x256xf32>
      %116 = vector.broadcast %108 : vector<1x256xf32> to vector<8x256xf32>
      %117 = arith.subf %104, %116 : vector<8x256xf32>
      %cst_61 = arith.constant 9.99999974E-6 : f32
      %118 = vector.broadcast %cst_61 : f32 to vector<1x256xf32>
      %119 = arith.addf %115, %118 : vector<1x256xf32>
      %120 = math.rsqrt %119 : vector<1x256xf32>
      %121 = vector.broadcast %120 : vector<1x256xf32> to vector<8x256xf32>
      %122 = arith.mulf %117, %121 : vector<8x256xf32>
      %123 = tpu.concatenate %103, %122 in 0 : vector<8x256xf32>, vector<8x256xf32> -> vector<16x256xf32>
      %124 = vector.broadcast %21 : vector<1x256xf32> to vector<16x256xf32>
      %125 = arith.mulf %123, %124 : vector<16x256xf32>
      %126 = vector.broadcast %22 : vector<1x256xf32> to vector<16x256xf32>
      %127 = arith.addf %125, %126 : vector<16x256xf32>
      %cst_62 = arith.constant 0.000000e+00 : f32
      %128 = vector.broadcast %cst_62 : f32 to vector<16x256xf32>
      %129 = arith.maximumf %127, %128 : vector<16x256xf32>
      %130 = arith.truncf %129 : vector<16x256xf32> to vector<16x256xbf16>
      %cst_63 = arith.constant dense<0.000000e+00> : vector<16x128xf32>
      %131 = tpu.matmul %130, %23, %cst_63 {dimension_numbers = #tpu.dot_dimension_numbers<[1], [0], [0], [1], [0, 0, 1, 1], [], []>} : vector<16x256xbf16>, vector<256x128xbf16>, vector<16x128xf32> -> vector<16x128xf32>
      %132 = vector.broadcast %24 : vector<1x128xf32> to vector<16x128xf32>
      %133 = arith.addf %131, %132 : vector<16x128xf32>
      %134 = vector.extract_strided_slice %133 {offsets = [0, 0], sizes = [8, 128], strides = [1, 1]} : vector<16x128xf32> to vector<8x128xf32>
      %135 = vector.extract_strided_slice %80 {offsets = [8, 0], sizes = [8, 128], strides = [1, 1]} : vector<16x128xf32> to vector<8x128xf32>
      %136 = arith.mulf %134, %134 : vector<8x128xf32>
      %cst_64 = arith.constant dense<0.000000e+00> : vector<8xf32>
      %137 = vector.multi_reduction <add>, %136, %cst_64 [1] : vector<8x128xf32> to vector<8xf32>
      %138 = vector.shape_cast %137 : vector<8xf32> to vector<8x1xf32>
      %cst_65 = arith.constant 9.99999996E-13 : f32
      %139 = vector.broadcast %cst_65 : f32 to vector<8x1xf32>
      %140 = arith.maximumf %138, %139 : vector<8x1xf32>
      %141 = math.rsqrt %140 : vector<8x1xf32>
      %142 = vector.broadcast %141 : vector<8x1xf32> to vector<8x128xf32>
      %143 = arith.mulf %134, %142 : vector<8x128xf32>
      %144 = arith.mulf %135, %135 : vector<8x128xf32>
      %cst_66 = arith.constant dense<0.000000e+00> : vector<8xf32>
      %145 = vector.multi_reduction <add>, %144, %cst_66 [1] : vector<8x128xf32> to vector<8xf32>
      %146 = vector.shape_cast %145 : vector<8xf32> to vector<8x1xf32>
      %cst_67 = arith.constant 9.99999996E-13 : f32
      %147 = vector.broadcast %cst_67 : f32 to vector<8x1xf32>
      %148 = arith.maximumf %146, %147 : vector<8x1xf32>
      %149 = math.rsqrt %148 : vector<8x1xf32>
      %150 = vector.broadcast %149 : vector<8x1xf32> to vector<8x128xf32>
      %151 = arith.mulf %135, %150 : vector<8x128xf32>
      %152 = arith.mulf %143, %151 : vector<8x128xf32>
      %cst_68 = arith.constant dense<0.000000e+00> : vector<8xf32>
      %153 = vector.multi_reduction <add>, %152, %cst_68 [1] : vector<8x128xf32> to vector<8xf32>
      %154 = vector.shape_cast %153 : vector<8xf32> to vector<8x1xf32>
      %cst_69 = arith.constant 2.000000e+00 : f32
      %155 = vector.broadcast %cst_69 : f32 to vector<8x1xf32>
      %156 = arith.mulf %155, %154 : vector<8x1xf32>
      %cst_70 = arith.constant 2.000000e+00 : f32
      %157 = vector.broadcast %cst_70 : f32 to vector<8x1xf32>
      %158 = arith.subf %157, %156 : vector<8x1xf32>
      %159 = vector.extract_strided_slice %133 {offsets = [8, 0], sizes = [8, 128], strides = [1, 1]} : vector<16x128xf32> to vector<8x128xf32>
      %160 = vector.extract_strided_slice %80 {offsets = [0, 0], sizes = [8, 128], strides = [1, 1]} : vector<16x128xf32> to vector<8x128xf32>
      %161 = arith.mulf %159, %159 : vector<8x128xf32>
      %cst_71 = arith.constant dense<0.000000e+00> : vector<8xf32>
      %162 = vector.multi_reduction <add>, %161, %cst_71 [1] : vector<8x128xf32> to vector<8xf32>
      %163 = vector.shape_cast %162 : vector<8xf32> to vector<8x1xf32>
      %cst_72 = arith.constant 9.99999996E-13 : f32
      %164 = vector.broadcast %cst_72 : f32 to vector<8x1xf32>
      %165 = arith.maximumf %163, %164 : vector<8x1xf32>
      %166 = math.rsqrt %165 : vector<8x1xf32>
      %167 = vector.broadcast %166 : vector<8x1xf32> to vector<8x128xf32>
      %168 = arith.mulf %159, %167 : vector<8x128xf32>
      %169 = arith.mulf %160, %160 : vector<8x128xf32>
      %cst_73 = arith.constant dense<0.000000e+00> : vector<8xf32>
      %170 = vector.multi_reduction <add>, %169, %cst_73 [1] : vector<8x128xf32> to vector<8xf32>
      %171 = vector.shape_cast %170 : vector<8xf32> to vector<8x1xf32>
      %cst_74 = arith.constant 9.99999996E-13 : f32
      %172 = vector.broadcast %cst_74 : f32 to vector<8x1xf32>
      %173 = arith.maximumf %171, %172 : vector<8x1xf32>
      %174 = math.rsqrt %173 : vector<8x1xf32>
      %175 = vector.broadcast %174 : vector<8x1xf32> to vector<8x128xf32>
      %176 = arith.mulf %160, %175 : vector<8x128xf32>
      %177 = arith.mulf %168, %176 : vector<8x128xf32>
      %cst_75 = arith.constant dense<0.000000e+00> : vector<8xf32>
      %178 = vector.multi_reduction <add>, %177, %cst_75 [1] : vector<8x128xf32> to vector<8xf32>
      %179 = vector.shape_cast %178 : vector<8xf32> to vector<8x1xf32>
      %cst_76 = arith.constant 2.000000e+00 : f32
      %180 = vector.broadcast %cst_76 : f32 to vector<8x1xf32>
      %181 = arith.mulf %180, %179 : vector<8x1xf32>
      %cst_77 = arith.constant 2.000000e+00 : f32
      %182 = vector.broadcast %cst_77 : f32 to vector<8x1xf32>
      %183 = arith.subf %182, %181 : vector<8x1xf32>
      %184 = arith.addf %158, %183 : vector<8x1xf32>
      %185 = vector.shape_cast %184 : vector<8x1xf32> to vector<1x8x1xf32>
      %cst_78 = arith.constant dense<0.000000e+00> : vector<1xf32>
      %186 = vector.multi_reduction <add>, %185, %cst_78 [1, 2] : vector<1x8x1xf32> to vector<1xf32>
      %187 = vector.shape_cast %186 : vector<1xf32> to vector<1x1x1xf32>
      %188 = vector.extract %187[0, 0, 0] : f32 from vector<1x1x1xf32>
      %cst_79 = arith.constant 8.000000e+00 : f32
      %189 = arith.divf %188, %cst_79 : f32
      %190 = vector.broadcast %189 : f32 to vector<1x1xf32>
      %c0_80 = arith.constant 0 : index
      %c0_81 = arith.constant 0 : index
      %191 = vector.load %arg16[%c0_80, %c0_81] : memref<1x1xf32, #tpu.memory_space<vmem>>, vector<1x1xf32>
      tpu.vector_store %arg16[%c0_80, %c0_81], %190 {strides = array<i32>} : memref<1x1xf32, #tpu.memory_space<vmem>>, vector<1x1xf32>,
    } else {
    }
    return
  }
  func.func @transform_0(%arg0: i32) -> (i32, i32) {
    %c0_i32 = arith.constant 0 : i32
    %c0_i32_0 = arith.constant 0 : i32
    return %c0_i32, %arg0 : i32, i32
  }
  func.func @transform_1(%arg0: i32) -> (i32, i32) {
    %c0_i32 = arith.constant 0 : i32
    %c0_i32_0 = arith.constant 0 : i32
    return %arg0, %c0_i32 : i32, i32
  }
  func.func @transform_2(%arg0: i32) -> (i32, i32) {
    %c0_i32 = arith.constant 0 : i32
    %c0_i32_0 = arith.constant 0 : i32
    %c0_i32_1 = arith.constant 0 : i32
    return %c0_i32, %c0_i32_0 : i32, i32
  }
  func.func @transform_3(%arg0: i32) -> (i32, i32) {
    %c0_i32 = arith.constant 0 : i32
    %c0_i32_0 = arith.constant 0 : i32
    %c0_i32_1 = arith.constant 0 : i32
    return %c0_i32, %c0_i32_0 : i32, i32
  }
  func.func @transform_4(%arg0: i32) -> (i32, i32) {
    %c0_i32 = arith.constant 0 : i32
    %c0_i32_0 = arith.constant 0 : i32
    %c0_i32_1 = arith.constant 0 : i32
    return %c0_i32, %c0_i32_0 : i32, i32
  }
  func.func @transform_5(%arg0: i32) -> (i32, i32) {
    %c0_i32 = arith.constant 0 : i32
    %c0_i32_0 = arith.constant 0 : i32
    %c0_i32_1 = arith.constant 0 : i32
    return %c0_i32, %c0_i32_0 : i32, i32
  }
  func.func @transform_6(%arg0: i32) -> (i32, i32) {
    %c0_i32 = arith.constant 0 : i32
    %c0_i32_0 = arith.constant 0 : i32
    %c0_i32_1 = arith.constant 0 : i32
    return %c0_i32, %c0_i32_0 : i32, i32
  }
  func.func @transform_7(%arg0: i32) -> (i32, i32) {
    %c0_i32 = arith.constant 0 : i32
    %c0_i32_0 = arith.constant 0 : i32
    %c0_i32_1 = arith.constant 0 : i32
    return %c0_i32, %c0_i32_0 : i32, i32
  }
  func.func @transform_8(%arg0: i32) -> (i32, i32) {
    %c0_i32 = arith.constant 0 : i32
    %c0_i32_0 = arith.constant 0 : i32
    %c0_i32_1 = arith.constant 0 : i32
    return %c0_i32, %c0_i32_0 : i32, i32
  }
  func.func @transform_9(%arg0: i32) -> (i32, i32) {
    %c0_i32 = arith.constant 0 : i32
    %c0_i32_0 = arith.constant 0 : i32
    %c0_i32_1 = arith.constant 0 : i32
    return %c0_i32, %c0_i32_0 : i32, i32
  }
  func.func @transform_10(%arg0: i32) -> (i32, i32) {
    %c0_i32 = arith.constant 0 : i32
    %c0_i32_0 = arith.constant 0 : i32
    %c0_i32_1 = arith.constant 0 : i32
    return %c0_i32, %c0_i32_0 : i32, i32
  }
  func.func @transform_11(%arg0: i32) -> (i32, i32) {
    %c0_i32 = arith.constant 0 : i32
    %c0_i32_0 = arith.constant 0 : i32
    %c0_i32_1 = arith.constant 0 : i32
    return %c0_i32, %c0_i32_0 : i32, i32
  }
  func.func @transform_12(%arg0: i32) -> (i32, i32) {
    %c0_i32 = arith.constant 0 : i32
    %c0_i32_0 = arith.constant 0 : i32
    %c0_i32_1 = arith.constant 0 : i32
    return %c0_i32, %c0_i32_0 : i32, i32
  }
  func.func @transform_13(%arg0: i32) -> (i32, i32) {
    %c0_i32 = arith.constant 0 : i32
    %c0_i32_0 = arith.constant 0 : i32
    %c0_i32_1 = arith.constant 0 : i32
    return %c0_i32, %c0_i32_0 : i32, i32
  }
  func.func @transform_14(%arg0: i32) -> (i32, i32) {
    %c0_i32 = arith.constant 0 : i32
    %c0_i32_0 = arith.constant 0 : i32
    %c0_i32_1 = arith.constant 0 : i32
    return %c0_i32, %c0_i32_0 : i32, i32
  }
  func.func @transform_15(%arg0: i32) -> (i32, i32) {
    %c0_i32 = arith.constant 0 : i32
    %c0_i32_0 = arith.constant 0 : i32
    %c0_i32_1 = arith.constant 0 : i32
    return %c0_i32, %c0_i32_0 : i32, i32
  }
}

</mosaic_0001>

<bundles_post_ra>
// kernel: tpu_custom_call.1
= control target key start
LH: loop header
LB: loop body
LE: loop exit
PB: predicated region body
PF: predicated region fallthrough
CT: control target
= control target key end

     0   :  { %20 = vsyncpa [#allocation4], 0  ;;  %s2727_s0 = inlined_call_operand.hbm [shape: bf16[16,1024], index: 0, kind: input, shape index: {}]   ;;  %s2728_s1 = inlined_call_operand.hbm [shape: bf16[1024,128], index: 1, kind: input, shape index: {}]   ;;  %s2729_s2 = inlined_call_operand.hbm [shape: f32[1,128], index: 2, kind: input, shape index: {}]   ;;  %s2730_s3 = inlined_call_operand.hbm [shape: bf16[128,256], index: 3, kind: input, shape index: {}]   ;;  %s2731_s4 = inlined_call_operand.vmem [shape: f32[1,256], index: 4, kind: input, shape index: {}]   ;;  %s2732_s5 = inlined_call_operand.vmem [shape: f32[1,256], index: 5, kind: input, shape index: {}]   ;;  %s2733_s6 = inlined_call_operand.vmem [shape: f32[1,256], index: 6, kind: input, shape index: {}]   ;;  %s2734_s7 = inlined_call_operand.hbm [shape: bf16[256,128], index: 7, kind: input, shape index: {}]   ;;  %s2735_s8 = inlined_call_operand.vmem [shape: f32[1,128], index: 8, kind: input, shape index: {}]   ;;  %s2736_s9 = inlined_call_operand.hbm [shape: bf16[128,256], index: 9, kind: input, shape index: {}]   ;;  %s2737_s10 = inlined_call_operand.vmem [shape: f32[1,256], index: 10, kind: input, shape index: {}]   ;;  %s2738_s11 = inlined_call_operand.vmem [shape: f32[1,256], index: 11, kind: input, shape index: {}]   ;;  %s2739_s12 = inlined_call_operand.vmem [shape: f32[1,256], index: 12, kind: input, shape index: {}]   ;;  %s2740_s13 = inlined_call_operand.hbm [shape: bf16[256,128], index: 13, kind: input, shape index: {}]   ;;  %s2741_s14 = inlined_call_operand.vmem [shape: f32[1,128], index: 14, kind: input, shape index: {}]   ;;  %s2742_s15 = inlined_call_operand.hbm [shape: f32[1,1], index: 15, kind: output, shape index: {}]  }
   0x1   :  { %21 = vsyncpa [#allocation7], 0 }
   0x2   :  { %22 = vsyncpa [#allocation10], 0 }
   0x3   :  { %23 = vsyncpa [#allocation13], 0 }
   0x4   :  { %24 = vsyncpa [#allocation5], 0  ;;  %s2491_s18 = smov [#allocation6]  }
   0x5   :  { %s42_s19 = sshll.u32 %s2491_s18, 4  ;;  %s43_s19 = int_to_ptr.vmem [resolvable:$true] %s42_s19 }
   0x6   :  { %s2329_s20 = scalar_lea.vmem %s43_s19, 8192  ;;  %p2334_p1 = scmp.lt.s32.totalorder %s43_s19, %s43_s19 }
   0x7   :  { %p2330_p0 = scmp.ne.s32.totalorder %s43_s19, %s2329_s20  ;;  %p2335_p2 = scmp.lt.s32.totalorder %s2329_s20, %s2329_s20 }
   0x9   :  { %p2336_p3 = por %p2335_p2, %p2334_p1 }
   0xb   :  { %p2337_p4 = pnand %p2336_p3, %p2330_p0 }
   0xd   :  { %2340 = shalt.err (!%p2337_p4)
}
   0xe   :  { %s2492_s21 = smov 64   ;;  %s2493_s22 = smov 4  }
   0xf   :  { %48 = dma.hbm_to_vmem [thread:$0]  %s2728_s1, 8192, %s43_s19, [#allocation7], %s2492_s21, %s2492_s21, %s2493_s22  }
  0x10   :  { %s2494_s25 = smov [#allocation9]  }
  0x11   :  { %s64_s26 = sshll.u32 %s2494_s25, 4  ;;  %s65_s26 = int_to_ptr.vmem [resolvable:$true] %s64_s26 }
  0x12   :  { %s2349_s27 = scalar_lea.vmem %s65_s26, 2048  ;;  %p2354_p6 = scmp.lt.s32.totalorder %s65_s26, %s65_s26 }
  0x13   :  { %p2350_p5 = scmp.ne.s32.totalorder %s65_s26, %s2349_s27  ;;  %p2355_p7 = scmp.lt.s32.totalorder %s2349_s27, %s2349_s27 }
  0x15   :  { %p2356_p8 = por %p2355_p7, %p2354_p6 }
  0x17   :  { %p2357_p9 = pnand %p2356_p8, %p2350_p5 }
  0x19   :  { %2360 = shalt.err (!%p2357_p9)
}
  0x1a   :  { %s2495_s28 = smov 128   ;;  %s2496_s29 = smov 8  }
  0x1b   :  { %70 = dma.hbm_to_vmem [thread:$0]  %s2730_s3, 2048, %s65_s26, [#allocation10], %s2495_s28, %s2495_s28, %s2496_s29  }
  0x1c   :  { %s2497_s17 = smov [#allocation12]   ;;  %s2498_s20 = smov [#allocation3]  }
  0x1d   :  { %s96_s18 = sshll.u32 %s2497_s17, 4  ;;  %s30_s1 = sshll.u32 %s2498_s20, 4  ;;  %s97_s18 = int_to_ptr.vmem [resolvable:$true] %s96_s18  ;;  %s31_s1 = int_to_ptr.vmem [resolvable:$true] %s30_s1 }
  0x1e   :  { %s2369_s19 = scalar_lea.vmem %s97_s18, 2048  ;;  %p2374_p11 = scmp.lt.s32.totalorder %s97_s18, %s97_s18 }
  0x1f   :  { %p2370_p10 = scmp.ne.s32.totalorder %s97_s18, %s2369_s19  ;;  %p2375_p12 = scmp.lt.s32.totalorder %s2369_s19, %s2369_s19 }
  0x21   :  { %p2376_p13 = por %p2375_p12, %p2374_p11 }
  0x23   :  { %p2377_p0 = pnand %p2376_p13, %p2370_p10 }
  0x25   :  { %2380 = shalt.err (!%p2377_p0)
}
  0x26   :  { %102 = dma.hbm_to_vmem [thread:$0]  %s2736_s9, 2048, %s97_s18, [#allocation13], %s2495_s28, %s2495_s28, %s2496_s29  }
  0x27   :  { %s2389_s25 = scalar_lea.vmem %s31_s1, 1024  ;;  %p2394_p2 = scmp.lt.s32.totalorder %s31_s1, %s31_s1 }
  0x28   :  { %p2390_p1 = scmp.ne.s32.totalorder %s31_s1, %s2389_s25  ;;  %p2395_p3 = scmp.lt.s32.totalorder %s2389_s25, %s2389_s25 }
  0x2a   :  { %p2396_p4 = por %p2395_p3, %p2394_p2 }
  0x2c   :  { %p2397_p5 = pnand %p2396_p4, %p2390_p1 }
  0x2e   :  { %2400 = shalt.err (!%p2397_p5)
}
  0x2f   :  { %s2499_s3 = smov 512   ;;  %s2500_s26 = smov 32  }
  0x30   :  { %36 = dma.hbm_to_vmem [thread:$0]  %s2727_s0, 1024, %s31_s1, [#allocation4], %s2499_s3, %s2499_s3, %s2500_s26  }
  0x31   :  { %s2501_s16 = smov [#allocation8]   ;;  %s2502_s20 = smov [#allocation11]  }
  0x32   :  { %s55_s17 = sshll.u32 %s2501_s16, 4  ;;  %s82_s19 = sshll.u32 %s2502_s20, 4  ;;  %s56_s17 = int_to_ptr.vmem [resolvable:$true] %s55_s17  ;;  %s83_s19 = int_to_ptr.vmem [resolvable:$true] %s82_s19 }
  0x33   :  { %s2409_s9 = scalar_lea.vmem %s56_s17, 16  ;;  %s2413_s28 = scalar_lea.vmem %s56_s17, 32 }
  0x34   :  { %p2410_p6 = scmp.ne.s32.totalorder %s56_s17, %s2409_s9  ;;  %p2414_p7 = scmp.lt.s32.totalorder %s56_s17, %s56_s17 }
  0x35   :  { %p2415_p8 = scmp.lt.s32.totalorder %s2413_s28, %s2409_s9 }
  0x37   :  { %p2416_p9 = por %p2415_p8, %p2414_p7 }
  0x39   :  { %p2417_p10 = pnand %p2416_p9, %p2410_p6 }
  0x3b   :  { %2420 = shalt.err (!%p2417_p10)
}
  0x3c   :  { %58 = dma.hbm_to_vmem [thread:$0]  %s2729_s2, 16, %s56_s17, [#allocation7]  }
  0x3d   :  { %s2429_s23 = scalar_lea.vmem %s83_s19, 2048  ;;  %p2434_p12 = scmp.lt.s32.totalorder %s83_s19, %s83_s19 }
  0x3e   :  { %p2430_p11 = scmp.ne.s32.totalorder %s83_s19, %s2429_s23  ;;  %p2435_p13 = scmp.lt.s32.totalorder %s2429_s23, %s2429_s23 }
  0x40   :  { %p2436_p0 = por %p2435_p13, %p2434_p12 }
  0x42   :  { %p2437_p1 = pnand %p2436_p0, %p2430_p11 }
  0x44   :  { %2440 = shalt.err (!%p2437_p1)
}
  0x45   :  { %88 = dma.hbm_to_vmem [thread:$0]  %s2734_s7, 2048, %s83_s19, [#allocation10], %s2492_s21, %s2492_s21, %s2493_s22  }
  0x46   :  { %s2503_s24 = smov [#allocation14]  }
  0x47   :  { %s114_s25 = sshll.u32 %s2503_s24, 4  ;;  %s115_s25 = int_to_ptr.vmem [resolvable:$true] %s114_s25 }
  0x48   :  { %s2449_s3 = scalar_lea.vmem %s115_s25, 2048  ;;  %p2454_p3 = scmp.lt.s32.totalorder %s115_s25, %s115_s25 }
  0x49   :  { %p2450_p2 = scmp.ne.s32.totalorder %s115_s25, %s2449_s3  ;;  %p2455_p4 = scmp.lt.s32.totalorder %s2449_s3, %s2449_s3 }
  0x4b   :  { %p2456_p5 = por %p2455_p4, %p2454_p3 }
  0x4d   :  { %p2457_p6 = pnand %p2456_p5, %p2450_p2 }
  0x4f   :  { %2460 = shalt.err (!%p2457_p6)
}
  0x50   :  { %120 = dma.hbm_to_vmem [thread:$0]  %s2740_s13, 2048, %s115_s25, [#allocation13], %s2492_s21, %s2492_s21, %s2493_s22  }
  0x51   :  { %2481 = dma.done.wait [#allocation4], 1024  }
  0x52   :  { %2482 = vsyncadd [#allocation4], 4294966272 }
  0x53   :  { %2483 = dma.done.wait [#allocation7], 8208  }
  0x54   :  { %2484 = vsyncadd [#allocation7], 4294959088 }
  0x55   :  { %2485 = dma.done.wait [#allocation10], 4096  }
  0x56   :  { %2486 = vsyncadd [#allocation10], 4294963200 }
  0x57   :  { %2487 = dma.done.wait [#allocation13], 4096  }
  0x58   :  { %2488 = vsyncadd [#allocation13], 4294963200  ;;  %v2153_v0 = vld [vmem:[#allocation6 + $0x78] sm:$0xff]   ;;  %v2157_v4 = vld [vmem:[#allocation6 + $0x70] sm:$0xff]   ;;  %vm1830_vm0 = vcmask 7168   ;;  %vm1845_vm1 = vcmask 0  }
  0x59   :  { %v2154_v1 = vld [vmem:[#allocation6 + $0xf8] sm:$0xff]   ;;  %2004 = vmatprep.subr.bf16.mxu0 %v2153_v0  ;;  %v2158_v5 = vld [vmem:[#allocation6 + $0xf0] sm:$0xff]   ;;  %v2161_v8 = vld [vmem:[#allocation6 + $0x68] sm:$0xff]  }
  0x5a   :  { %v2155_v2 = vld [vmem:[#allocation6 + $0x38] sm:$0xff]   ;;  %2026 = vmatprep.subr.bf16.mxu1 %v2154_v1  ;;  %v2159_v6 = vld [vmem:[#allocation6 + $0x30] sm:$0xff]   ;;  %v2162_v9 = vld [vmem:[#allocation6 + $0xe8] sm:$0xff]  }
  0x5b   :  { %v2156_v3 = vld [vmem:[#allocation6 + $0xb8] sm:$0xff]   ;;  %2005 = vmatpush3.bf16.msra.mxu0 %v2155_v2  ;;  %v2160_v7 = vld [vmem:[#allocation6 + $0xb0] sm:$0xff]   ;;  %v2163_v10 = vld [vmem:[#allocation6 + $0x28] sm:$0xff]  }
  0x5c   :  { %2027 = vmatpush3.bf16.msra.mxu1 %v2156_v3  ;;  %2006 = vmatprep.subr.bf16.mxu0 %v2157_v4  ;;  %v2164_v11 = vld [vmem:[#allocation6 + $0xa8] sm:$0xff]   ;;  %v2165_v12 = vld [vmem:[#allocation6 + $0x60] sm:$0xff]   ;;  %v2169_v16 = vld [vmem:[#allocation6 + $0x58] sm:$0xff]  }
  0x5d   :  { %2028 = vmatprep.subr.bf16.mxu1 %v2158_v5  ;;  %v2166_v13 = vld [vmem:[#allocation6 + $0xe0] sm:$0xff]   ;;  %v2170_v17 = vld [vmem:[#allocation6 + $0xd8] sm:$0xff]   ;;  %v2173_v20 = vld [vmem:[#allocation6 + $0x50] sm:$0xff]  }
  0x5e   :  { %v2167_v14 = vld [vmem:[#allocation6 + $0x20] sm:$0xff]   ;;  %v2171_v18 = vld [vmem:[#allocation6 + $0x18] sm:$0xff]   ;;  %v2174_v21 = vld [vmem:[#allocation6 + $0xd0] sm:$0xff]  }
  0x5f   :  { %2007 = vmatpush3.bf16.msra.mxu0 %v2159_v6  ;;  %v2168_v15 = vld [vmem:[#allocation6 + $0xa0] sm:$0xff]   ;;  %v2172_v19 = vld [vmem:[#allocation6 + $0x98] sm:$0xff]   ;;  %v2175_v22 = vld [vmem:[#allocation6 + $0x10] sm:$0xff]  }
  0x60   :  { %2029 = vmatpush3.bf16.msra.mxu1 %v2160_v7  ;;  %2008 = vmatprep.subr.bf16.mxu0 %v2161_v8  ;;  %v2176_v23 = vld [vmem:[#allocation6 + $0x90] sm:$0xff]   ;;  %v2177_v24 = vld [vmem:[#allocation6 + $0x48] sm:$0xff]   ;;  %v2181_v28 = vld [vmem:[#allocation6 + $0x40] sm:$0xff]  }
  0x61   :  { %2030 = vmatprep.subr.bf16.mxu1 %v2162_v9  ;;  %v2178_v25 = vld [vmem:[#allocation6 + $0xc8] sm:$0xff]   ;;  %v2182_v29 = vld [vmem:[#allocation6 + $0xc0] sm:$0xff]   ;;  %v2185_v40 = vld [vmem:[#allocation6 + $0x178] sm:$0xff]  }
  0x62   :  { %v2179_v26 = vld [vmem:[#allocation6 + $0x8] sm:$0xff]   ;;  %v2183_v30 = vld [vmem:[#allocation6] sm:$0xff]   ;;  %v2186_v41 = vld [vmem:[#allocation6 + $0x1f8] sm:$0xff]  }
  0x63   :  { %2009 = vmatpush3.bf16.msra.mxu0 %v2163_v10  ;;  %v2180_v27 = vld [vmem:[#allocation6 + $0x88] sm:$0xff]   ;;  %v2184_v31 = vld [vmem:[#allocation6 + $0x80] sm:$0xff]   ;;  %v2187_v42 = vld [vmem:[#allocation6 + $0x138] sm:$0xff]  }
  0x64   :  { %2031 = vmatpush3.bf16.msra.mxu1 %v2164_v11  ;;  %2010 = vmatprep.subr.bf16.mxu0 %v2165_v12  ;;  %v153_v32 = vld [vmem:[#allocation3] sm:$0xff]  ;;  %v154_v34 = vld [vmem:[#allocation3 + $0x8] sm:$0xff]  ;;  %v2188_v43 = vld [vmem:[#allocation6 + $0x1b8] sm:$0xff]  }
  0x65   :  { %2032 = vmatprep.subr.bf16.mxu1 %v2166_v13  ;;  %v157_v33 = vld [vmem:[#allocation3 + $0x20] sm:$0xff]  ;;  %v158_v37 = vld [vmem:[#allocation3 + $0x28] sm:$0xff]  ;;  %v2189_v44 = vld [vmem:[#allocation6 + $0x170] sm:$0xff]  }
  0x66   :  { %v1865_v35 = vcombine.low %v153_v32, %v157_v33  ;;  %v1866_v36 = vcombine.high %v153_v32, %v157_v33  ;;  %v1867_v38 = vcombine.low %v154_v34, %v158_v37  ;;  %v1868_v39 = vcombine.high %v154_v34, %v158_v37  ;;  %v2190_v45 = vld [vmem:[#allocation6 + $0x1f0] sm:$0xff]   ;;  %v2193_v48 = vld [vmem:[#allocation6 + $0x168] sm:$0xff]   ;;  %v2197_v52 = vld [vmem:[#allocation6 + $0x160] sm:$0xff]  }
  0x67   :  { %2011 = vmatpush3.bf16.msra.mxu0 %v2167_v14  ;;  %v2191_v46 = vld [vmem:[#allocation6 + $0x130] sm:$0xff]   ;;  %v2194_v49 = vld [vmem:[#allocation6 + $0x1e8] sm:$0xff]   ;;  %v2198_v53 = vld [vmem:[#allocation6 + $0x1e0] sm:$0xff]   ;;  %v2504_v32 = vmov 0  }
  0x68   :  { %2033 = vmatpush3.bf16.msra.mxu1 %v2168_v15  ;;  %2012 = vmatprep.subr.bf16.mxu0 %v2169_v16  ;;  %v2192_v47 = vld [vmem:[#allocation6 + $0x1b0] sm:$0xff]   ;;  %v2195_v50 = vld [vmem:[#allocation6 + $0x128] sm:$0xff]   ;;  %v2199_v54 = vld [vmem:[#allocation6 + $0x120] sm:$0xff]  }
  0x69   :  { %2034 = vmatprep.subr.bf16.mxu1 %v2170_v17  ;;  %745 = vmatprep.mubr.bf16.mxu0 %v1866_v36  ;;  %v2196_v51 = vld [vmem:[#allocation6 + $0x1a8] sm:$0xff]   ;;  %v2200_v55 = vld [vmem:[#allocation6 + $0x1a0] sm:$0xff]   ;;  %v2201_v56 = vld [vmem:[#allocation6 + $0x158] sm:$0xff]  }
  0x6a   :  { %786 = vmatprep.mubr.bf16.mxu1 %v1868_v39  ;;  %v2202_v57 = vld [vmem:[#allocation6 + $0x1d8] sm:$0xff]   ;;  %v2205_v60 = vld [vmem:[#allocation6 + $0x150] sm:$0xff]   ;;  %v2209_v0 = vld [vmem:[#allocation6 + $0x148] sm:$0xff]  }
  0x6b   :  { %2013 = vmatpush3.bf16.msra.mxu0 %v2171_v18  ;;  %v2203_v58 = vld [vmem:[#allocation6 + $0x118] sm:$0xff]   ;;  %v2206_v61 = vld [vmem:[#allocation6 + $0x1d0] sm:$0xff]   ;;  %v2210_v1 = vld [vmem:[#allocation6 + $0x1c8] sm:$0xff]  }
  0x6c   :  { %2035 = vmatpush3.bf16.msra.mxu1 %v2172_v19  ;;  %2014 = vmatprep.subr.bf16.mxu0 %v2173_v20  ;;  %v2204_v59 = vld [vmem:[#allocation6 + $0x198] sm:$0xff]   ;;  %v2207_v62 = vld [vmem:[#allocation6 + $0x110] sm:$0xff]   ;;  %v2211_v2 = vld [vmem:[#allocation6 + $0x108] sm:$0xff]  }
  0x6d   :  { %2036 = vmatprep.subr.bf16.mxu1 %v2174_v21  ;;  %v2208_v63 = vld [vmem:[#allocation6 + $0x190] sm:$0xff]   ;;  %v2212_v3 = vld [vmem:[#allocation6 + $0x188] sm:$0xff]   ;;  %v2213_v4 = vld [vmem:[#allocation6 + $0x140] sm:$0xff]  }
  0x6e   :  { %v2214_v5 = vld [vmem:[#allocation6 + $0x1c0] sm:$0xff]   ;;  %v155_v8 = vld [vmem:[#allocation3 + $0x10] sm:$0xff]  ;;  %v156_v12 = vld [vmem:[#allocation3 + $0x18] sm:$0xff] }
  0x6f   :  { %2015 = vmatpush3.bf16.msra.mxu0 %v2175_v22  ;;  %v2215_v6 = vld [vmem:[#allocation6 + $0x100] sm:$0xff]   ;;  %v159_v9 = vld [vmem:[#allocation3 + $0x30] sm:$0xff]  ;;  %v160_v13 = vld [vmem:[#allocation3 + $0x38] sm:$0xff] }
  0x70   :  { %2037 = vmatpush3.bf16.msra.mxu1 %v2176_v23  ;;  %2016 = vmatprep.subr.bf16.mxu0 %v2177_v24  ;;  %v2216_v7 = vld [vmem:[#allocation6 + $0x180] sm:$0xff]   ;;  %v1869_v10 = vcombine.low %v155_v8, %v159_v9  ;;  %v1870_v11 = vcombine.high %v155_v8, %v159_v9  ;;  %v1871_v14 = vcombine.low %v156_v12, %v160_v13  ;;  %v2217_v16 = vld [vmem:[#allocation9 + $0x70] ss:$8 sps:$4 sm:$0xff]   ;;  %v2246_v8 = vld [vmem:[#allocation11 + $0x28] sm:$0xff]  }
  0x71   :  { %2038 = vmatprep.subr.bf16.mxu1 %v2178_v25  ;;  %v1872_v15 = vcombine.high %v156_v12, %v160_v13  ;;  %v2219_v17 = vld [vmem:[#allocation9 + $0x74] ss:$8 sps:$4 sm:$0xff]   ;;  %v2222_v18 = vld [vmem:[#allocation9 + $0x64] ss:$8 sps:$4 sm:$0xff]   ;;  %v2220_v19 = vld [vmem:[#allocation9 + $0x60] ss:$8 sps:$4 sm:$0xff]  }
  0x72   :  { %v2225_v20 = vld [vmem:[#allocation9 + $0x54] ss:$8 sps:$4 sm:$0xff]   ;;  %v2223_v21 = vld [vmem:[#allocation9 + $0x50] ss:$8 sps:$4 sm:$0xff]   ;;  %v2228_v22 = vld [vmem:[#allocation9 + $0x44] ss:$8 sps:$4 sm:$0xff]  }
  0x73   :  { %2017 = vmatpush3.bf16.msra.mxu0 %v2179_v26  ;;  %v2226_v23 = vld [vmem:[#allocation9 + $0x40] ss:$8 sps:$4 sm:$0xff]   ;;  %v2231_v24 = vld [vmem:[#allocation9 + $0x34] ss:$8 sps:$4 sm:$0xff]   ;;  %v2229_v25 = vld [vmem:[#allocation9 + $0x30] ss:$8 sps:$4 sm:$0xff]  }
  0x74   :  { %2039 = vmatpush3.bf16.msra.mxu1 %v2180_v27  ;;  %2018 = vmatprep.subr.bf16.mxu0 %v2181_v28  ;;  %v2234_v26 = vld [vmem:[#allocation9 + $0x24] ss:$8 sps:$4 sm:$0xff]   ;;  %v2232_v27 = vld [vmem:[#allocation9 + $0x20] ss:$8 sps:$4 sm:$0xff]   ;;  %v2237_v28 = vld [vmem:[#allocation9 + $0x14] ss:$8 sps:$4 sm:$0xff]  }
  0x75   :  { %2040 = vmatprep.subr.bf16.mxu1 %v2182_v29  ;;  %v2235_v29 = vld [vmem:[#allocation9 + $0x10] ss:$8 sps:$4 sm:$0xff]   ;;  %v2247_v9 = vld [vmem:[#allocation11 + $0x60] sm:$0xff]  }
  0x76   :  { %v2250_v12 = vld [vmem:[#allocation11 + $0x18] sm:$0xff]   ;;  %v2251_v13 = vld [vmem:[#allocation11 + $0x50] sm:$0xff]  }
  0x77   :  { %2019 = vmatpush3.bf16.msra.mxu0 %v2183_v30  ;;  %v2240_v30 = vld [vmem:[#allocation9 + $0x4] ss:$8 sps:$4 sm:$0xff]  }
  0x78   :  { %2041 = vmatpush3.bf16.msra.mxu1 %v2184_v31  ;;  %2048 = vmatprep.subr.bf16.mxu0 %v2185_v40  ;;  %v2238_v31 = vld [vmem:[#allocation9] ss:$8 sps:$4 sm:$0xff]  }
  0x79   :  { %2070 = vmatprep.subr.bf16.mxu1 %v2186_v41 }
  0x7a   :  { %746 = vmatmul.mubr.bf16.vlgmr.msra.gmra.mxu0 %v1865_v35 }
  0x7b   :  { %787 = vmatmul.mubr.bf16.vlgmr.msra.gmra.mxu1 %v1867_v38  ;;  %2049 = vmatpush3.bf16.msra.mxu0 %v2187_v42 }
  0x7c   :  { %2071 = vmatpush3.bf16.msra.mxu1 %v2188_v43  ;;  %2050 = vmatprep.subr.bf16.mxu0 %v2189_v44 }
  0x7d   :  { %2072 = vmatprep.subr.bf16.mxu1 %v2190_v45  ;;  %827 = vmatprep.mubr.bf16.mxu0 %v1870_v11  ;;  %v2249_v11 = vld [vmem:[#allocation11 + $0x58] sm:$0xff]  }
  0x7e   :  { %868 = vmatprep.mubr.bf16.mxu1 %v1872_v15  ;;  %v2253_v15 = vld [vmem:[#allocation11 + $0x48] sm:$0xff]  }
  0x7f   :  { %2051 = vmatpush3.bf16.msra.mxu0 %v2191_v46 }
  0x80   :  { %2073 = vmatpush3.bf16.msra.mxu1 %v2192_v47  ;;  %2052 = vmatprep.subr.bf16.mxu0 %v2193_v48 }
  0x81   :  { %2074 = vmatprep.subr.bf16.mxu1 %v2194_v49 }
  0x83   :  { %2053 = vmatpush3.bf16.msra.mxu0 %v2195_v50 }
  0x84   :  { %2075 = vmatpush3.bf16.msra.mxu1 %v2196_v51  ;;  %2054 = vmatprep.subr.bf16.mxu0 %v2197_v52 }
  0x85   :  { %2076 = vmatprep.subr.bf16.mxu1 %v2198_v53 }
  0x87   :  { %2055 = vmatpush3.bf16.msra.mxu0 %v2199_v54 }
  0x88   :  { %2077 = vmatpush3.bf16.msra.mxu1 %v2200_v55  ;;  %2056 = vmatprep.subr.bf16.mxu0 %v2201_v56 }
  0x89   :  { %2078 = vmatprep.subr.bf16.mxu1 %v2202_v57 }
  0x8b   :  { %2057 = vmatpush3.bf16.msra.mxu0 %v2203_v58 }
  0x8c   :  { %2079 = vmatpush3.bf16.msra.mxu1 %v2204_v59  ;;  %2058 = vmatprep.subr.bf16.mxu0 %v2205_v60 }
  0x8d   :  { %2080 = vmatprep.subr.bf16.mxu1 %v2206_v61 }
  0x8f   :  { %2059 = vmatpush3.bf16.msra.mxu0 %v2207_v62  ;;  %v1937_v62 = vld [vmem:[#allocation8] ss:$0 sm:$0xff] }
  0x90   :  { %2081 = vmatpush3.bf16.msra.mxu1 %v2208_v63  ;;  %2060 = vmatprep.subr.bf16.mxu0 %v2209_v0 }
  0x91   :  { %2082 = vmatprep.subr.bf16.mxu1 %v2210_v1 }
  0x93   :  { %2061 = vmatpush3.bf16.msra.mxu0 %v2211_v2 }
  0x94   :  { %2083 = vmatpush3.bf16.msra.mxu1 %v2212_v3  ;;  %2062 = vmatprep.subr.bf16.mxu0 %v2213_v4  ;;  %v2241_v3 = vld [vmem:[#allocation11 + $0x78] sm:$0xff]  }
  0x95   :  { %2084 = vmatprep.subr.bf16.mxu1 %v2214_v5  ;;  %v2242_v4 = vld [vmem:[#allocation11 + $0x38] sm:$0xff]   ;;  %v2243_v5 = vld [vmem:[#allocation11 + $0x70] sm:$0xff]  }
  0x97   :  { %2063 = vmatpush3.bf16.msra.mxu0 %v2215_v6  ;;  %v2244_v6 = vld [vmem:[#allocation11 + $0x30] sm:$0xff]  }
  0x98   :  { %2085 = vmatpush3.bf16.msra.mxu1 %v2216_v7  ;;  %1091 = vmatprep.subr.bf16.mxu0 %v2219_v17  ;;  %v2245_v7 = vld [vmem:[#allocation11 + $0x68] sm:$0xff]   ;;  %v2255_v17 = vld [vmem:[#allocation11 + $0x40] sm:$0xff]  }
  0x99   :  { %2092 = vmatprep.subr.bf16.mxu1 %v2241_v3 }
  0x9a   :  { %828 = vmatmul.mubr.bf16.vlgmr.msra.gmra.mxu0 %v1869_v10  ;;  %v2248_v10 = vld [vmem:[#allocation11 + $0x20] sm:$0xff]  }
  0x9b   :  { %869 = vmatmul.mubr.bf16.vlgmr.msra.gmra.mxu1 %v1871_v14  ;;  %1092 = vmatpush1.bf16.msra.mxu0 %v2217_v16  ;;  %v2252_v14 = vld [vmem:[#allocation11 + $0x10] sm:$0xff]   ;;  %v2254_v16 = vld [vmem:[#allocation11 + $0x8] sm:$0xff]  }
  0x9c   :  { %1093 = vmatprep.subr.bf16.mxu0 %v2222_v18  ;;  %1123 = vmatprep.mubr.bf16.mxu0 %v2504_v32  ;;  %v2256_v18 = vld [vmem:[#allocation11] sm:$0xff]  }
  0x9d   :  { %2093 = vmatpush3.bf16.msra.mxu1 %v2242_v4 }
  0x9e   :  { %2094 = vmatprep.subr.bf16.mxu1 %v2243_v5 }
  0x9f   :  { %1094 = vmatpush1.bf16.msra.mxu0 %v2220_v19  ;;  %v2257_v19 = vld [vmem:[#allocation12 + $0x70] ss:$8 sps:$4 sm:$0xff]  }
  0xa0   :  { %1095 = vmatprep.subr.bf16.mxu0 %v2225_v20  ;;  %v2259_v20 = vld [vmem:[#allocation12 + $0x74] ss:$8 sps:$4 sm:$0xff]  }
  0xa1   :  { %2095 = vmatpush3.bf16.msra.mxu1 %v2244_v6 }
  0xa2   :  { %2096 = vmatprep.subr.bf16.mxu1 %v2245_v7 }
  0xa3   :  { %1096 = vmatpush1.bf16.msra.mxu0 %v2223_v21  ;;  %v2262_v21 = vld [vmem:[#allocation12 + $0x64] ss:$8 sps:$4 sm:$0xff]  }
  0xa4   :  { %1097 = vmatprep.subr.bf16.mxu0 %v2228_v22  ;;  %v2260_v22 = vld [vmem:[#allocation12 + $0x60] ss:$8 sps:$4 sm:$0xff]  }
  0xa5   :  { %2097 = vmatpush3.bf16.msra.mxu1 %v2246_v8 }
  0xa6   :  { %2098 = vmatprep.subr.bf16.mxu1 %v2247_v9 }
  0xa7   :  { %1098 = vmatpush1.bf16.msra.mxu0 %v2226_v23  ;;  %v2265_v23 = vld [vmem:[#allocation12 + $0x54] ss:$8 sps:$4 sm:$0xff]  }
  0xa8   :  { %1099 = vmatprep.subr.bf16.mxu0 %v2231_v24  ;;  %v2263_v24 = vld [vmem:[#allocation12 + $0x50] ss:$8 sps:$4 sm:$0xff]  }
  0xa9   :  { %2099 = vmatpush3.bf16.msra.mxu1 %v2248_v10 }
  0xaa   :  { %2100 = vmatprep.subr.bf16.mxu1 %v2249_v11 }
  0xab   :  { %1100 = vmatpush1.bf16.msra.mxu0 %v2229_v25  ;;  %v2268_v25 = vld [vmem:[#allocation12 + $0x44] ss:$8 sps:$4 sm:$0xff]  }
  0xac   :  { %1101 = vmatprep.subr.bf16.mxu0 %v2234_v26  ;;  %v2266_v26 = vld [vmem:[#allocation12 + $0x40] ss:$8 sps:$4 sm:$0xff]  }
  0xad   :  { %2101 = vmatpush3.bf16.msra.mxu1 %v2250_v12 }
  0xae   :  { %2102 = vmatprep.subr.bf16.mxu1 %v2251_v13 }
  0xaf   :  { %1102 = vmatpush1.bf16.msra.mxu0 %v2232_v27  ;;  %v2271_v27 = vld [vmem:[#allocation12 + $0x34] ss:$8 sps:$4 sm:$0xff]  }
  0xb0   :  { %1103 = vmatprep.subr.bf16.mxu0 %v2237_v28  ;;  %v2269_v28 = vld [vmem:[#allocation12 + $0x30] ss:$8 sps:$4 sm:$0xff]  }
  0xb1   :  { %2103 = vmatpush3.bf16.msra.mxu1 %v2252_v14 }
  0xb2   :  { %2104 = vmatprep.subr.bf16.mxu1 %v2253_v15 }
  0xb3   :  { %1104 = vmatpush1.bf16.msra.mxu0 %v2235_v29  ;;  %v1001_v29 = vlaneseq }
  0xb4   :  { %1105 = vmatprep.subr.bf16.mxu0 %v2240_v30 }
  0xb5   :  { %2105 = vmatpush3.bf16.msra.mxu1 %v2254_v16  ;;  %v1002_v30 = vshrl.u32 %v1001_v29, 7 }
  0xb6   :  { %2106 = vmatprep.subr.bf16.mxu1 %v2255_v17 }
  0xb7   :  { %1106 = vmatpush1.bf16.msra.mxu0 %v2238_v31  ;;  %v2616_v31 = vsub.s32 0, %v1002_v30 }
  0xb8   :  { %1489 = vmatprep.subr.bf16.mxu0 %v2259_v20 }
  0xb9   :  { %2107 = vmatpush3.bf16.msra.mxu1 %v2256_v18 }
 0x13a   :  { %v2020_v33 = vpop.f32.mrf.mxu0 }
 0x13b   :  { %v2042_v34 = vpop.f32.mrf.mxu1 }
 0x13c   :  { %v2021_v35 = vpop.f32.mrf.mxu0 }
 0x13d   :  { %v2043_v36 = vpop.f32.mrf.mxu1  ;;  %v2022_v40 = vadd.f32 %v2021_v35, %v2020_v33  ;;  %v2621_v33 = vsub.s32 1, %v1002_v30 }
 0x13e   :  { %v2023_v37 = vpop.f32.mrf.mxu0  ;;  %v2044_v41 = vadd.f32 %v2043_v36, %v2042_v34 }
 0x13f   :  { %v2045_v38 = vpop.f32.mrf.mxu1 }
 0x140   :  { %v2024_v39 = vpop.f32.mrf.mxu0  ;;  %v789_v46 = vadd.f32 %v2044_v41, %v2022_v40 }
 0x141   :  { %v2046_v42 = vpop.f32.mrf.mxu1  ;;  %v2025_v47 = vadd.f32 %v2024_v39, %v2023_v37 }
 0x142   :  { %v2047_v48 = vadd.f32 %v2046_v42, %v2045_v38 }
 0x144   :  { %v792_v55 = vadd.f32 %v2047_v48, %v2025_v47 }
 0x15a   :  { %v2064_v43 = vpop.f32.mrf.mxu0 }
 0x15b   :  { %v2086_v44 = vpop.f32.mrf.mxu1 }
 0x15c   :  { %v2065_v45 = vpop.f32.mrf.mxu0 }
 0x15d   :  { %v2066_v49 = vadd.f32 %v2065_v45, %v2064_v43  ;;  %v2087_v50 = vpop.f32.mrf.mxu1 }
 0x15e   :  { %v2067_v51 = vpop.f32.mrf.mxu0  ;;  %v2088_v56 = vadd.f32 %v2087_v50, %v2086_v44 }
 0x15f   :  { %v830_v52 = vadd.f32 %v2066_v49, %v789_v46  ;;  %v2089_v53 = vpop.f32.mrf.mxu1 }
 0x160   :  { %v2068_v54 = vpop.f32.mrf.mxu0 }
 0x161   :  { %v2069_v57 = vadd.f32 %v2068_v54, %v2067_v51  ;;  %v2090_v58 = vpop.f32.mrf.mxu1  ;;  %v871_v59 = vadd.f32 %v2088_v56, %v830_v52 }
 0x162   :  { %v2091_v61 = vadd.f32 %v2090_v58, %v2089_v53 }
 0x163   :  { %v833_v60 = vadd.f32 %v2069_v57, %v792_v55  ;;  %v997_v0 = vadd.f32 %v1937_v62, %v871_v59 }
 0x165   :  { %v874_v63 = vadd.f32 %v2091_v61, %v833_v60 }
 0x167   :  { %v998_v1 = vadd.f32 %v1937_v62, %v874_v63 }
 0x169   :  { %v999_v2 = vpack.c.bf16 %v998_v1, %v997_v0 }
 0x16b   :  { %1124 = vmatmul.mubr.bf16.vlgmr.msra.gmra.mxu0 %v999_v2 }
 0x16c   :  { %1521 = vmatprep.mubr.bf16.mxu0 %v2504_v32  ;;  %1490 = vmatpush1.bf16.msra.mxu0 %v2257_v19  ;;  %v901_v32 = vld [vmem:[%s2731_s4] sm:$0x3] }
 0x16d   :  { %1491 = vmatprep.subr.bf16.mxu0 %v2262_v21  ;;  %v1004_v34 = vrot.slane %v901_v32, %v2616_v31  ;;  %v1008_v35 = vrot.slane %v901_v32, %v2621_v33 }
 0x170   :  { %1492 = vmatpush1.bf16.msra.mxu0 %v2260_v22 }
 0x171   :  { %1493 = vmatprep.subr.bf16.mxu0 %v2265_v23 }
 0x174   :  { %1494 = vmatpush1.bf16.msra.mxu0 %v2263_v24 }
 0x175   :  { %1495 = vmatprep.subr.bf16.mxu0 %v2268_v25 }
 0x178   :  { %1496 = vmatpush1.bf16.msra.mxu0 %v2266_v26 }
 0x179   :  { %1497 = vmatprep.subr.bf16.mxu0 %v2271_v27 }
 0x17c   :  { %1498 = vmatpush1.bf16.msra.mxu0 %v2269_v28 }
 0x22b   :  { %v1125_v36 = vpop.f32.mrf.mxu0 }
 0x22c   :  { %v2625_v37 = vadd.f32 %v1125_v36, %v1004_v34 }
 0x22d   :  { %v1127_v38 = vpop.f32.mrf.mxu0 }
 0x22e   :  { %v1134_v39 = vrot.slane %v2625_v37, 4  ;;  %v1148_v40 = vmul.f32 %v2625_v37, %v2625_v37  ;;  %v2630_v41 = vadd.f32 %v1127_v38, %v1008_v35 }
 0x22f   :  { %v1129_v42 = vpop.f32.mrf.mxu0 }
 0x230   :  { %v1135_v43 = vadd.f32 %v1134_v39, %v2625_v37  ;;  %v1150_v44 = vrot.slane %v1148_v40, 4  ;;  %v1140_v45 = vrot.slane %v2630_v41, 4  ;;  %v1149_v46 = vmul.f32 %v2630_v41, %v2630_v41 }
 0x231   :  { %v2636_v47 = vadd.f32 %v1129_v42, %v1004_v34  ;;  %v1131_v48 = vpop.f32.mrf.mxu0 }
 0x232   :  { %v1136_v49 = vrot.slane %v1135_v43, 2  ;;  %v1151_v50 = vadd.f32 %v1150_v44, %v1148_v40  ;;  %v1141_v51 = vadd.f32 %v1140_v45, %v2630_v41  ;;  %v1156_v52 = vrot.slane %v1149_v46, 4 }
 0x233   :  { %v1176_v53 = vrot.slane %v2636_v47, 4  ;;  %v1190_v54 = vmul.f32 %v2636_v47, %v2636_v47  ;;  %v2642_v55 = vadd.f32 %v1131_v48, %v1008_v35 }
 0x234   :  { %v1137_v56 = vadd.f32 %v1136_v49, %v1135_v43  ;;  %v1152_v57 = vrot.slane %v1151_v50, 2  ;;  %v1142_v58 = vrot.slane %v1141_v51, 2  ;;  %v1157_v59 = vadd.f32 %v1156_v52, %v1149_v46 }
 0x235   :  { %v1177_v60 = vadd.f32 %v1176_v53, %v2636_v47  ;;  %v1192_v61 = vrot.slane %v1190_v54, 4  ;;  %v1182_v62 = vrot.slane %v2642_v55, 4  ;;  %v1191_v63 = vmul.f32 %v2642_v55, %v2642_v55 }
 0x236   :  { %v1138_v0 = vrot.slane %v1137_v56, 1  ;;  %v1153_v1 = vadd.f32 %v1152_v57, %v1151_v50  ;;  %v1143_v2 = vadd.f32 %v1142_v58, %v1141_v51  ;;  %v1158_v3 = vrot.slane %v1157_v59, 2 }
 0x237   :  { %v1178_v4 = vrot.slane %v1177_v60, 2  ;;  %v1193_v5 = vadd.f32 %v1192_v61, %v1190_v54  ;;  %v1183_v6 = vadd.f32 %v1182_v62, %v2642_v55  ;;  %v1198_v7 = vrot.slane %v1191_v63, 4 }
 0x238   :  { %v1139_v8 = vadd.f32 %v1138_v0, %v1137_v56  ;;  %v1154_v9 = vrot.slane %v1153_v1, 1  ;;  %v1144_v10 = vrot.slane %v1143_v2, 1  ;;  %v1159_v11 = vadd.f32 %v1158_v3, %v1157_v59  ;;  %v902_v59 = vld [vmem:[%s2732_s5] sm:$0x3] }
 0x239   :  { %v1179_v12 = vadd.f32 %v1178_v4, %v1177_v60  ;;  %v1194_v13 = vrot.slane %v1193_v5, 2  ;;  %v1184_v14 = vrot.slane %v1183_v6, 2  ;;  %v1199_v15 = vadd.f32 %v1198_v7, %v1191_v63 }
 0x23a   :  { %v1146_v16 = vmul.f32 0.125, %v1139_v8  ;;  %v1155_v17 = vadd.f32 %v1154_v9, %v1153_v1  ;;  %v1145_v18 = vadd.f32 %v1144_v10, %v1143_v2  ;;  %v1160_v19 = vrot.slane %v1159_v11, 1 }
 0x23b   :  { %v1180_v20 = vrot.slane %v1179_v12, 1  ;;  %v1195_v21 = vadd.f32 %v1194_v13, %v1193_v5  ;;  %v1185_v22 = vadd.f32 %v1184_v14, %v1183_v6  ;;  %v1200_v23 = vrot.slane %v1199_v15, 2  ;;  %v903_v5 = vld [vmem:[%s2733_s6] sm:$0x3] }
 0x23c   :  { %v1162_v24 = vmul.f32 0.125, %v1155_v17  ;;  %v1164_v25 = vmul.f32 %v1146_v16, %v1146_v16  ;;  %v1147_v26 = vmul.f32 0.125, %v1145_v18  ;;  %v1161_v27 = vadd.f32 %v1160_v19, %v1159_v11 }
 0x23d   :  { %v1181_v28 = vadd.f32 %v1180_v20, %v1179_v12  ;;  %v1196_v29 = vrot.slane %v1195_v21, 1  ;;  %v1186_v30 = vrot.slane %v1185_v22, 1  ;;  %v1201_v35 = vadd.f32 %v1200_v23, %v1199_v15  ;;  %v2272_v23 = vld [vmem:[#allocation12 + $0x20] ss:$8 sps:$4 sm:$0xff]  }
 0x23e   :  { %v1166_v32 = vsub.f32 %v1162_v24, %v1164_v25  ;;  %v1165_v34 = vmul.f32 %v1147_v26, %v1147_v26  ;;  %v1163_v36 = vmul.f32 0.125, %v1161_v27  ;;  %v1168_v60 = vsub.f32 %v2625_v37, %v1146_v16  ;;  %v2277_v24 = vld [vmem:[#allocation12 + $0x14] ss:$8 sps:$4 sm:$0xff]   ;;  %v2275_v25 = vld [vmem:[#allocation12 + $0x10] ss:$8 sps:$4 sm:$0xff]  }
 0x23f   :  { %v1188_v38 = vmul.f32 0.125, %v1181_v28  ;;  %v1197_v39 = vadd.f32 %v1196_v29, %v1195_v21  ;;  %v1187_v40 = vadd.f32 %v1186_v30, %v1185_v22  ;;  %v1202_v43 = vrot.slane %v1201_v35, 1  ;;  %v2274_v22 = vld [vmem:[#allocation12 + $0x24] ss:$8 sps:$4 sm:$0xff]   ;;  %v2278_v27 = vld [vmem:[#allocation12] ss:$8 sps:$4 sm:$0xff]  }
 0x240   :  { %v1170_v42 = vadd.f32 1e-05, %v1166_v32  ;;  %v1167_v44 = vsub.f32 %v1163_v36, %v1165_v34  ;;  %v1169_v61 = vsub.f32 %v2630_v41, %v1147_v26  ;;  %v1226_v63 = vrot.slane %v902_v59, %v2621_v33  ;;  %1499 = vmatprep.subr.bf16.mxu0 %v2274_v22  ;;  %v2280_v26 = vld [vmem:[#allocation12 + $0x4] ss:$8 sps:$4 sm:$0xff]   ;;  %v1954_v34 = vld [vmem:[%s2735_s8] ss:$0 sm:$0xff] }
 0x241   :  { %v1204_v45 = vmul.f32 0.125, %v1197_v39  ;;  %v1206_v46 = vmul.f32 %v1188_v38, %v1188_v38  ;;  %v1189_v48 = vmul.f32 0.125, %v1187_v40  ;;  %v1203_v49 = vadd.f32 %v1202_v43, %v1201_v35  ;;  %1500 = vmatpush1.bf16.msra.mxu0 %v2272_v23  ;;  %v2282_v43 = vld [vmem:[#allocation14 + $0x38] sm:$0xff]  }
 0x242   :  { %2297 = vrsqrt.f32 %v1170_v42  ;;  %v1171_v50 = vadd.f32 1e-05, %v1167_v44  ;;  %v1210_v1 = vsub.f32 %v2636_v47, %v1188_v38  ;;  %v1222_v3 = vrot.slane %v902_v59, %v2616_v31  ;;  %1501 = vmatprep.subr.bf16.mxu0 %v2277_v24  ;;  %v2281_v42 = vld [vmem:[#allocation14 + $0x78] sm:$0xff]   ;;  %v2283_v44 = vld [vmem:[#allocation14 + $0x70] sm:$0xff]   ;;  %v2296_v59 = vld [vmem:[#allocation14] sm:$0xff]  }
 0x243   :  { %v1208_v51 = vsub.f32 %v1204_v45, %v1206_v46  ;;  %v1205_v52 = vmul.f32 0.125, %v1203_v49  ;;  %v1207_v53 = vmul.f32 %v1189_v48, %v1189_v48  ;;  %v1211_v7 = vsub.f32 %v2642_v55, %v1189_v48  ;;  %2114 = vmatprep.subr.bf16.mxu1 %v2281_v42  ;;  %v2284_v45 = vld [vmem:[#allocation14 + $0x30] sm:$0xff]   ;;  %v2285_v46 = vld [vmem:[#allocation14 + $0x68] sm:$0xff]   ;;  %v2287_v49 = vld [vmem:[#allocation14 + $0x60] sm:$0xff]  }
 0x244   :  { %2299 = vrsqrt.f32 %v1171_v50  ;;  %v1241_v41 = vrot.slane %v903_v5, %v2621_v33  ;;  %v1237_v9 = vrot.slane %v903_v5, %v2616_v31  ;;  %v2286_v48 = vld [vmem:[#allocation14 + $0x28] sm:$0xff]   ;;  %v2288_v50 = vld [vmem:[#allocation14 + $0x20] sm:$0xff]  }
 0x245   :  { %v1212_v54 = vadd.f32 1e-05, %v1208_v51  ;;  %v1209_v56 = vsub.f32 %v1205_v52, %v1207_v53  ;;  %1502 = vmatpush1.bf16.msra.mxu0 %v2275_v25  ;;  %v2289_v51 = vld [vmem:[#allocation14 + $0x58] sm:$0xff]   ;;  %v2291_v53 = vld [vmem:[#allocation14 + $0x50] sm:$0xff]  }
 0x246   :  { %1503 = vmatprep.subr.bf16.mxu0 %v2280_v26  ;;  %v2290_v52 = vld [vmem:[#allocation14 + $0x18] sm:$0xff]  }
 0x247   :  { %2301 = vrsqrt.f32 %v1212_v54  ;;  %v1213_v57 = vadd.f32 1e-05, %v1209_v56  ;;  %v2292_v54 = vld [vmem:[#allocation14 + $0x10] sm:$0xff]   ;;  %v2293_v56 = vld [vmem:[#allocation14 + $0x48] sm:$0xff]  }
 0x249   :  { %2303 = vrsqrt.f32 %v1213_v57  ;;  %1504 = vmatpush1.bf16.msra.mxu0 %v2278_v27  ;;  %v2294_v57 = vld [vmem:[#allocation14 + $0x8] sm:$0xff]  }
 0x24f   :  { %v2298_v58 = vpop.eup %2297 }
 0x250   :  { %v1174_v0 = vmul.f32 %v2298_v58, %v1168_v60  ;;  %v2295_v58 = vld [vmem:[#allocation14 + $0x40] sm:$0xff]   ;;  %v953_v60 = vld [vmem:[%s2737_s10] sm:$0x3] }
 0x251   :  { %v2300_v62 = vpop.eup %2299 }
 0x252   :  { %v1175_v2 = vmul.f32 %v2300_v62, %v1169_v61  ;;  %v1229_v10 = vmul.f32 %v1222_v3, %v1174_v0  ;;  %v1402_v61 = vrot.slane %v953_v60, %v2616_v31  ;;  %v1406_v62 = vrot.slane %v953_v60, %v2621_v33 }
 0x254   :  { %v2302_v4 = vpop.eup %2301  ;;  %v1230_v37 = vmul.f32 %v1226_v63, %v1175_v2  ;;  %v1244_v15 = vadd.f32 %v1237_v9, %v1229_v10 }
 0x255   :  { %v1216_v6 = vmul.f32 %v2302_v4, %v1210_v1 }
 0x256   :  { %v2304_v8 = vpop.eup %2303  ;;  %v1245_v14 = vadd.f32 %v1241_v41, %v1230_v37  ;;  %v1248_v20 = vmax.f32 %v1244_v15, 0.0 }
 0x257   :  { %v1231_v11 = vmul.f32 %v1222_v3, %v1216_v6  ;;  %v1217_v47 = vmul.f32 %v2304_v8, %v1211_v7 }
 0x258   :  { %v1249_v18 = vmax.f32 %v1245_v14, 0.0 }
 0x259   :  { %v1246_v12 = vadd.f32 %v1237_v9, %v1231_v11  ;;  %v1232_v13 = vmul.f32 %v1226_v63, %v1217_v47 }
 0x25b   :  { %v1247_v16 = vadd.f32 %v1241_v41, %v1232_v13  ;;  %v1250_v17 = vmax.f32 %v1246_v12, 0.0 }
 0x25d   :  { %v1251_v19 = vmax.f32 %v1247_v16, 0.0  ;;  %v1252_v55 = vpack.c.bf16 %v1250_v17, %v1248_v20 }
 0x25f   :  { %v1253_v21 = vpack.c.bf16 %v1251_v19, %v1249_v18 }
 0x261   :  { %1388 = vmatprep.mubr.bf16.mxu1 %v1253_v21 }
 0x262   :  { %1389 = vmatmul.mubr.bf16.vlgmr.msra.gmra.mxu1 %v1252_v55 }
 0x263   :  { %2115 = vmatpush3.bf16.msra.mxu1 %v2282_v43 }
 0x264   :  { %2116 = vmatprep.subr.bf16.mxu1 %v2283_v44 }
 0x267   :  { %2117 = vmatpush3.bf16.msra.mxu1 %v2284_v45 }
 0x268   :  { %2118 = vmatprep.subr.bf16.mxu1 %v2285_v46 }
 0x26b   :  { %2119 = vmatpush3.bf16.msra.mxu1 %v2286_v48 }
 0x26c   :  { %2120 = vmatprep.subr.bf16.mxu1 %v2287_v49 }
 0x26f   :  { %2121 = vmatpush3.bf16.msra.mxu1 %v2288_v50 }
 0x270   :  { %2122 = vmatprep.subr.bf16.mxu1 %v2289_v51 }
 0x273   :  { %2123 = vmatpush3.bf16.msra.mxu1 %v2290_v52 }
 0x274   :  { %2124 = vmatprep.subr.bf16.mxu1 %v2291_v53 }
 0x277   :  { %2125 = vmatpush3.bf16.msra.mxu1 %v2292_v54 }
 0x278   :  { %2126 = vmatprep.subr.bf16.mxu1 %v2293_v56 }
 0x27b   :  { %2127 = vmatpush3.bf16.msra.mxu1 %v2294_v57 }
 0x27c   :  { %2128 = vmatprep.subr.bf16.mxu1 %v2295_v58 }
 0x27f   :  { %2129 = vmatpush3.bf16.msra.mxu1 %v2296_v59 }
 0x322   :  { %v2108_v28 = vpop.f32.mrf.mxu1 }
 0x324   :  { %v2109_v29 = vpop.f32.mrf.mxu1 }
 0x325   :  { %v2110_v32 = vadd.f32 %v2109_v29, %v2108_v28 }
 0x326   :  { %v2111_v30 = vpop.f32.mrf.mxu1 }
 0x327   :  { %v2666_v38 = vadd.f32 %v2110_v32, %v1954_v34 }
 0x328   :  { %v2112_v35 = vpop.f32.mrf.mxu1 }
 0x329   :  { %v2113_v36 = vadd.f32 %v2112_v35, %v2111_v30 }
 0x32b   :  { %v2668_v39 = vadd.f32 %v2113_v36, %v1954_v34 }
 0x32d   :  { %v1397_v40 = vpack.c.bf16 %v2668_v39, %v2666_v38 }
 0x32f   :  { %1522 = vmatmul.mubr.bf16.vlgmr.msra.gmra.mxu0 %v1397_v40 }
 0x3ef   :  { %v1523_v63 = vpop.f32.mrf.mxu0 }
 0x3f0   :  { %v2677_v0 = vadd.f32 %v1523_v63, %v1402_v61 }
 0x3f1   :  { %v1525_v1 = vpop.f32.mrf.mxu0 }
 0x3f2   :  { %v1532_v2 = vrot.slane %v2677_v0, 4  ;;  %v1546_v3 = vmul.f32 %v2677_v0, %v2677_v0  ;;  %v2682_v4 = vadd.f32 %v1525_v1, %v1406_v62 }
 0x3f3   :  { %v1527_v5 = vpop.f32.mrf.mxu0 }
 0x3f4   :  { %v1533_v6 = vadd.f32 %v1532_v2, %v2677_v0  ;;  %v1548_v7 = vrot.slane %v1546_v3, 4  ;;  %v1538_v37 = vrot.slane %v2682_v4, 4  ;;  %v1547_v41 = vmul.f32 %v2682_v4, %v2682_v4 }
 0x3f5   :  { %v2688_v8 = vadd.f32 %v1527_v5, %v1402_v61  ;;  %v1529_v9 = vpop.f32.mrf.mxu0 }
 0x3f6   :  { %v1534_v10 = vrot.slane %v1533_v6, 2  ;;  %v1549_v11 = vadd.f32 %v1548_v7, %v1546_v3  ;;  %v1539_v47 = vadd.f32 %v1538_v37, %v2682_v4  ;;  %v1554_v12 = vrot.slane %v1547_v41, 4 }
 0x3f7   :  { %v1574_v13 = vrot.slane %v2688_v8, 4  ;;  %v1588_v14 = vmul.f32 %v2688_v8, %v2688_v8  ;;  %v2694_v15 = vadd.f32 %v1529_v9, %v1406_v62 }
 0x3f8   :  { %v1535_v16 = vadd.f32 %v1534_v10, %v1533_v6  ;;  %v1550_v17 = vrot.slane %v1549_v11, 2  ;;  %v1540_v18 = vrot.slane %v1539_v47, 2  ;;  %v1555_v19 = vadd.f32 %v1554_v12, %v1547_v41 }
 0x3f9   :  { %v1575_v20 = vadd.f32 %v1574_v13, %v2688_v8  ;;  %v1590_v21 = vrot.slane %v1588_v14, 4  ;;  %v1580_v55 = vrot.slane %v2694_v15, 4  ;;  %v1589_v22 = vmul.f32 %v2694_v15, %v2694_v15 }
 0x3fa   :  { %v1536_v23 = vrot.slane %v1535_v16, 1  ;;  %v1551_v24 = vadd.f32 %v1550_v17, %v1549_v11  ;;  %v1541_v25 = vadd.f32 %v1540_v18, %v1539_v47  ;;  %v1556_v26 = vrot.slane %v1555_v19, 2 }
 0x3fb   :  { %v1576_v27 = vrot.slane %v1575_v20, 2  ;;  %v1591_v28 = vadd.f32 %v1590_v21, %v1588_v14  ;;  %v1581_v29 = vadd.f32 %v1580_v55, %v2694_v15  ;;  %v1596_v30 = vrot.slane %v1589_v22, 4  ;;  %v954_v21 = vld [vmem:[%s2738_s11] sm:$0x3] }
 0x3fc   :  { %v1537_v32 = vadd.f32 %v1536_v23, %v1535_v16  ;;  %v1552_v34 = vrot.slane %v1551_v24, 1  ;;  %v1542_v35 = vrot.slane %v1541_v25, 1  ;;  %v1557_v36 = vadd.f32 %v1556_v26, %v1555_v19 }
 0x3fd   :  { %v1577_v40 = vadd.f32 %v1576_v27, %v1575_v20  ;;  %v1592_v42 = vrot.slane %v1591_v28, 2  ;;  %v1582_v43 = vrot.slane %v1581_v29, 2  ;;  %v1597_v44 = vadd.f32 %v1596_v30, %v1589_v22  ;;  %v955_v30 = vld [vmem:[%s2739_s12] sm:$0x3] }
 0x3fe   :  { %v1544_v45 = vmul.f32 0.125, %v1537_v32  ;;  %v1553_v46 = vadd.f32 %v1552_v34, %v1551_v24  ;;  %v1543_v48 = vadd.f32 %v1542_v35, %v1541_v25  ;;  %v1558_v49 = vrot.slane %v1557_v36, 1 }
 0x3ff   :  { %v1578_v50 = vrot.slane %v1577_v40, 1  ;;  %v1593_v51 = vadd.f32 %v1592_v42, %v1591_v28  ;;  %v1583_v52 = vadd.f32 %v1582_v43, %v1581_v29  ;;  %v1598_v53 = vrot.slane %v1597_v44, 2 }
 0x400   :  { %v1560_v54 = vmul.f32 0.125, %v1553_v46  ;;  %v1562_v56 = vmul.f32 %v1544_v45, %v1544_v45  ;;  %v1545_v57 = vmul.f32 0.125, %v1543_v48  ;;  %v1559_v58 = vadd.f32 %v1558_v49, %v1557_v36 }
 0x401   :  { %v1579_v59 = vadd.f32 %v1578_v50, %v1577_v40  ;;  %v1594_v60 = vrot.slane %v1593_v51, 1  ;;  %v1584_v61 = vrot.slane %v1583_v52, 1  ;;  %v1599_v1 = vadd.f32 %v1598_v53, %v1597_v44 }
 0x402   :  { %v1564_v62 = vsub.f32 %v1560_v54, %v1562_v56  ;;  %v1563_v63 = vmul.f32 %v1545_v57, %v1545_v57  ;;  %v1561_v2 = vmul.f32 0.125, %v1559_v58  ;;  %v1566_v55 = vsub.f32 %v2677_v0, %v1544_v45 }
 0x403   :  { %v1586_v3 = vmul.f32 0.125, %v1579_v59  ;;  %v1595_v5 = vadd.f32 %v1594_v60, %v1593_v51  ;;  %v1585_v6 = vadd.f32 %v1584_v61, %v1583_v52  ;;  %v1600_v37 = vrot.slane %v1599_v1, 1 }
 0x404   :  { %v1568_v7 = vadd.f32 1e-05, %v1564_v62  ;;  %v1565_v41 = vsub.f32 %v1561_v2, %v1563_v63  ;;  %v1567_v22 = vsub.f32 %v2682_v4, %v1545_v57  ;;  %v1624_v24 = vrot.slane %v954_v21, %v2621_v33 }
 0x405   :  { %v1602_v9 = vmul.f32 0.125, %v1595_v5  ;;  %v1604_v10 = vmul.f32 %v1586_v3, %v1586_v3  ;;  %v1587_v11 = vmul.f32 0.125, %v1585_v6  ;;  %v1601_v47 = vadd.f32 %v1600_v37, %v1599_v1 }
 0x406   :  { %2305 = vrsqrt.f32 %v1568_v7  ;;  %v1569_v12 = vadd.f32 1e-05, %v1565_v41  ;;  %v1608_v26 = vsub.f32 %v2688_v8, %v1586_v3  ;;  %v1620_v28 = vrot.slane %v954_v21, %v2616_v31 }
 0x407   :  { %v1606_v13 = vsub.f32 %v1602_v9, %v1604_v10  ;;  %v1603_v14 = vmul.f32 0.125, %v1601_v47  ;;  %v1605_v16 = vmul.f32 %v1587_v11, %v1587_v11  ;;  %v1609_v34 = vsub.f32 %v2694_v15, %v1587_v11 }
 0x408   :  { %2307 = vrsqrt.f32 %v1569_v12  ;;  %v1639_v4 = vrot.slane %v955_v30, %v2621_v33  ;;  %v1635_v36 = vrot.slane %v955_v30, %v2616_v31  ;;  %v1987_v31 = vld [vmem:[%s2741_s14] ss:$0 sm:$0xff]  ;;  %v1801_v1 = vmul.f32 %v2668_v39, %v2668_v39  ;;  %s2505_s14 = smov [#allocation15]  }
 0x409   :  { %v1610_v17 = vadd.f32 1e-05, %v1606_v13  ;;  %v1607_v18 = vsub.f32 %v1603_v14, %v1605_v16  ;;  %v1818_v2 = vmul.f32 %v2666_v38, %v2666_v38  ;;  %s1853_s19 = sshll.u32 %s2505_s14, 4  ;;  %s1854_s19 = int_to_ptr.vmem [resolvable:$true] %s1853_s19 }
 0x40a   :  { %s2461_s29 = scalar_lea.vmem %s1854_s19, 16  ;;  %s2465_s18 = scalar_lea.vmem %s1854_s19, 32 }
 0x40b   :  { %2309 = vrsqrt.f32 %v1610_v17  ;;  %v1611_v19 = vadd.f32 1e-05, %v1607_v18  ;;  %p2462_p7 = scmp.ne.s32.totalorder %s1854_s19, %s2461_s29  ;;  %p2466_p8 = scmp.lt.s32.totalorder %s1854_s19, %s1854_s19 }
 0x40c   :  { %p2467_p9 = scmp.lt.s32.totalorder %s2465_s18, %s2461_s29 }
 0x40d   :  { %2311 = vrsqrt.f32 %v1611_v19 }
 0x40e   :  { %p2468_p10 = por %p2467_p9, %p2466_p8 }
 0x410   :  { %p2469_p11 = pnand %p2468_p10, %p2462_p7 }
 0x413   :  { %v2306_v20 = vpop.eup %2305 }
 0x414   :  { %v1572_v25 = vmul.f32 %v2306_v20, %v1566_v55 }
 0x415   :  { %v2308_v23 = vpop.eup %2307 }
 0x416   :  { %v1573_v27 = vmul.f32 %v2308_v23, %v1567_v22  ;;  %v1627_v40 = vmul.f32 %v1620_v28, %v1572_v25 }
 0x418   :  { %v2310_v29 = vpop.eup %2309  ;;  %v1628_v0 = vmul.f32 %v1624_v24, %v1573_v27  ;;  %v1642_v46 = vadd.f32 %v1635_v36, %v1627_v40 }
 0x419   :  { %v1614_v32 = vmul.f32 %v2310_v29, %v1608_v26 }
 0x41a   :  { %v2312_v35 = vpop.eup %2311  ;;  %v1643_v45 = vadd.f32 %v1639_v4, %v1628_v0  ;;  %v1646_v52 = vmax.f32 %v1642_v46, 0.0 }
 0x41b   :  { %v1629_v42 = vmul.f32 %v1620_v28, %v1614_v32  ;;  %v1615_v8 = vmul.f32 %v2312_v35, %v1609_v34 }
 0x41c   :  { %v1647_v50 = vmax.f32 %v1643_v45, 0.0 }
 0x41d   :  { %v1644_v43 = vadd.f32 %v1635_v36, %v1629_v42  ;;  %v1630_v44 = vmul.f32 %v1624_v24, %v1615_v8 }
 0x41f   :  { %v1645_v48 = vadd.f32 %v1639_v4, %v1630_v44  ;;  %v1648_v49 = vmax.f32 %v1644_v43, 0.0 }
 0x421   :  { %v1649_v51 = vmax.f32 %v1645_v48, 0.0  ;;  %v1650_v15 = vpack.c.bf16 %v1648_v49, %v1646_v52 }
 0x423   :  { %v1651_v53 = vpack.c.bf16 %v1649_v51, %v1647_v50 }
 0x425   :  { %1786 = vmatprep.mubr.bf16.mxu1 %v1651_v53 }
 0x426   :  { %1787 = vmatmul.mubr.bf16.vlgmr.msra.gmra.mxu1 %v1650_v15 }
 0x4e6   :  { %v2130_v33 = vpop.f32.mrf.mxu1 }
 0x4e8   :  { %v2131_v54 = vpop.f32.mrf.mxu1 }
 0x4e9   :  { %v2132_v56 = vadd.f32 %v2131_v54, %v2130_v33 }
 0x4ea   :  { %v2133_v57 = vpop.f32.mrf.mxu1 }
 0x4eb   :  { %v1789_v58 = vadd.f32 %v2132_v56, %v1987_v31 }
 0x4ec   :  { %v2134_v59 = vpop.f32.mrf.mxu1 }
 0x4ed   :  { %v2135_v60 = vadd.f32 %v2134_v59, %v2133_v57  ;;  %v1795_v61 = vmul.f32 %v1789_v58, %v1789_v58 }
 0x4ef   :  { %1796 = vadd.xlane.f32.xlu0 %v1795_v61  ;;  %v1792_v62 = vadd.f32 %v2135_v60, %v1987_v31 }
 0x4f1   :  { %v1812_v63 = vmul.f32 %v1792_v62, %v1792_v62 }
 0x4f3   :  { %1813 = vadd.xlane.f32.xlu1 %v1812_v63  ;;  %1802 = vadd.xlane.f32.xlu0 %v1801_v1 }
 0x4f7   :  { %1819 = vadd.xlane.f32.xlu1 %v1818_v2 }
 0x578   :  { %v1797_v3 = vpop.xlane.xlu0 %1796 }
 0x579   :  { %v1798_v5 = vmax.f32 %v1797_v3, 1e-12 }
 0x57b   :  { %2313 = vrsqrt.f32 %v1798_v5 }
 0x57c   :  { %v1814_v6 = vpop.xlane.xlu1 %1813  ;;  %v1803_v7 = vpop.xlane.xlu0 %1802 }
 0x57d   :  { %v1815_v37 = vmax.f32 %v1814_v6, 1e-12  ;;  %v1804_v41 = vmax.f32 %v1803_v7, 1e-12 }
 0x57f   :  { %2315 = vrsqrt.f32 %v1804_v41 }
 0x580   :  { %v1820_v9 = vpop.xlane.xlu1 %1819  ;;  %2317 = vrsqrt.f32 %v1815_v37 }
 0x581   :  { %v1821_v10 = vmax.f32 %v1820_v9, 1e-12 }
 0x583   :  { %2319 = vrsqrt.f32 %v1821_v10 }
 0x588   :  { %v2314_v11 = vpop.eup %2313 }
 0x589   :  { %v1800_v13 = vmul.f32 %v2314_v11, %v1789_v58 }
 0x58c   :  { %v2316_v47 = vpop.eup %2315 }
 0x58d   :  { %v2318_v12 = vpop.eup %2317  ;;  %v1806_v14 = vmul.f32 %v2316_v47, %v2668_v39 }
 0x58e   :  { %v1817_v18 = vmul.f32 %v2318_v12, %v1792_v62 }
 0x58f   :  { %v1807_v17 = vmul.f32 %v1806_v14, %v1800_v13 }
 0x590   :  { %v2320_v16 = vpop.eup %2319 }
 0x591   :  { %v1823_v19 = vmul.f32 %v2320_v16, %v2666_v38  ;;  %1808 = vadd.xlane.f32.xlu0 %v1807_v17 }
 0x593   :  { %v1824_v20 = vmul.f32 %v1823_v19, %v1817_v18 }
 0x595   :  { %1825 = vadd.xlane.f32.xlu1 %v1824_v20 }
 0x61a   :  { %v1809_v21 = vpop.xlane.xlu0 %1808 }
 0x61b   :  { %v1810_v55 = vmul.f32 2.0, %v1809_v21 }
 0x61d   :  { %v1811_v24 = vsub.f32 2.0, %v1810_v55 }
 0x61e   :  { %v1826_v22 = vpop.xlane.xlu1 %1825 }
 0x61f   :  { %v1827_v23 = vmul.f32 2.0, %v1826_v22 }
 0x621   :  { %v1828_v25 = vsub.f32 2.0, %v1827_v23 }
 0x623   :  { %v1829_v26 = vadd.f32 %v1828_v25, %v1811_v24 }
 0x625   :  { %v1831_v27 = vsel %vm1830_vm0, %v1829_v26, 0.0 }
 0x626   :  { %1832 = vadd.xlane.f32.xlu0 %v1831_v27 }
 0x6af   :  { %v1833_v28 = vpop.xlane.xlu0 %1832 }
 0x6b0   :  { %v1834_v39 = vrot.slane %v1833_v28, 4 }
 0x6b2   :  { %v1835_v29 = vadd.f32 %v1834_v39, %v1833_v28 }
 0x6b4   :  { %v1836_v30 = vrot.slane %v1835_v29, 2 }
 0x6b6   :  { %v1837_v32 = vadd.f32 %v1836_v30, %v1835_v29 }
 0x6b8   :  { %v1838_v34 = vrot.slane %v1837_v32, 1 }
 0x6ba   :  { %v1839_v38 = vadd.f32 %v1838_v34, %v1837_v32 }
 0x6bc   :  { %2136 = vpush %v1839_v38 }
 0x6ed   :  { %s2137_s9 = spop %2136 }
 0x6ee   :  { %s1843_s28 = smul.f32 0.125, %s2137_s9 }
 0x6f0   :  { %v1844_v0 = vstv %s1843_s28 }
 0x6f1   :  { %1846 = vst.msk [vmem:[#allocation15] sm:$0x1] %vm1845_vm1, %v1844_v0 }
 0x6f2   :  { %2472 = shalt.err (!%p2469_p11)
}
 0x6f3   :  { %1856 = dma.vmem_to_hbm [thread:$0]  %s1854_s19, 16, %s2742_s15, [#allocation5]  }
 0x6f4   :  { %2489 = dma.done.wait [#allocation5], 16  }
 0x6f5   :  { %2490 = vsyncadd [#allocation5], 4294967280 }
 0x6f6   :  { %1860 = vsyncpa [#allocation4], 1 }
 0x6f7   :  { %1861 = vsyncpa [#allocation7], 1 }
 0x6f8   :  { %1862 = vsyncpa [#allocation10], 1 }
 0x6f9   :  { %1863 = vsyncpa [#allocation13], 1 }
 0x6fa   :  { %1864 = vsyncpa [#allocation5], 1 }

</bundles_post_ra>
